<compile_context>
chip_gen: v5e
topology: v5e:2x2
jax: 0.10.0
libtpu: 0.0.40
codegen_flags: <defaults>
</compile_context>

<pallas_src>
import functools

import jax
import jax.numpy as jnp
from jax.experimental import pallas as pl
from jax.experimental.pallas import tpu as pltpu


def _attention_kernel(x_ref, wqkv_ref, wprojr_ref, bproj_ref, out_ref, attn_ref,
                      q_sc, k_sc, v_sc, *, scale, q_block):
    H, N, dh = q_sc.shape
    C = H * dh
    qi = pl.program_id(1)

    # ---- once per batch element: qkv projection + head-major layout prep ----
    @pl.when(qi == 0)
    def _():
        x = x_ref[0]                                              # (N, C) bf16
        qkv = jnp.dot(x, wqkv_ref[...],
                      preferred_element_type=jnp.float32)         # (N, 3C) f32
        q = qkv[:, 0 * C:1 * C] * scale          # fold softmax scale into q (N*C ops)
        k = qkv[:, 1 * C:2 * C]
        v = qkv[:, 2 * C:3 * C]
        # One-time layout prep (outside the hot per-query-tile loop): scatter the
        # channel-blocked heads into head-major (H, N, dh) bf16 scratch so every
        # attention matmul below is a single leading-batch MXU contraction.
        for h in range(H):
            sl = slice(h * dh, (h + 1) * dh)
            q_sc[h] = q[:, sl].astype(jnp.bfloat16)
            k_sc[h] = k[:, sl].astype(jnp.bfloat16)
            v_sc[h] = v[:, sl].astype(jnp.bfloat16)

    # ---- per query tile: attention batched over all heads at once ----
    start = pl.multiple_of(qi * q_block, q_block)
    q_t = q_sc[:, pl.ds(start, q_block), :]                       # (H, TQ, dh) bf16

    scores = jnp.einsum('hqd,hkd->hqk', q_t, k_sc[...],
                        preferred_element_type=jnp.float32)       # (H, TQ, N) f32

    m = jnp.max(scores, axis=-1, keepdims=True)
    e = jnp.exp(scores - m)
    s = jnp.sum(e, axis=-1, keepdims=True)
    probs = e * pl.reciprocal(s, approx=True)                     # softmax in f32 (EUP recip)
    attn_ref[0] = probs                                           # single slab store

    ctx = jnp.einsum('hqk,hkd->hqd', probs.astype(jnp.bfloat16), v_sc[...],
                     preferred_element_type=jnp.float32)          # (H, TQ, dh) f32

    # Output projection: per-head partial products reduced over heads
    # (avoids the (H,TQ,dh)->(TQ,C) transpose/concat entirely).
    yh = jnp.einsum('hqd,hdc->hqc', ctx.astype(jnp.bfloat16), wprojr_ref[...],
                    preferred_element_type=jnp.float32)           # (H, TQ, C) f32
    y = jnp.sum(yh, axis=0) + bproj_ref[0]                        # (TQ, C) f32
    out_ref[0] = y.astype(out_ref.dtype)


def attention_forward(x, w_qkv, w_proj, b_proj, num_heads, *, q_block=128):
    """x: (B, N, C) f32. w_qkv: (3C, C), w_proj: (C, C), b_proj: (C,) — PyTorch layout."""
    B, N, C = x.shape
    assert C % num_heads == 0
    dh = C // num_heads
    scale = dh ** (-0.5)

    # Query tiling: bounds the (H, TQ, N) score/prob live range for large N and
    # shrinks the attn output block (v7x 64 MiB VMEM budget).
    TQ = q_block if (N % q_block == 0) else N
    nq = N // TQ

    # bf16 MXU operands; all accumulation inside the kernel is f32.
    x_bf = jnp.asarray(x, jnp.bfloat16)
    w_qkv_t = jnp.asarray(w_qkv, jnp.float32).T.astype(jnp.bfloat16)          # (C, 3C)
    w_proj_r = (jnp.asarray(w_proj, jnp.float32).T
                .reshape(num_heads, dh, C).astype(jnp.bfloat16))              # (H, dh, C)
    b_proj2d = jnp.asarray(b_proj, jnp.float32).reshape(1, C)

    kernel = functools.partial(_attention_kernel, scale=scale, q_block=TQ)

    # Advisory cost estimate so XLA schedules neighbours around the custom call.
    flops = (2 * B * N * C * 3 * C                 # qkv projection
             + 4 * B * num_heads * N * N * dh      # scores + attn @ v
             + 2 * B * N * C * C)                  # output projection
    transcendentals = B * num_heads * N * N
    bytes_accessed = (B * N * C * 2 + (3 * C * C + C * C) * 2 + C * 4
                      + B * N * C * 4 + B * num_heads * N * N * 4)
    cost = pl.CostEstimate(flops=flops, transcendentals=transcendentals,
                           bytes_accessed=bytes_accessed)

    # Explicit VMEM budget: resident blocks are double-buffered; keep within
    # v7x's 64 MiB while allowing bigger tiles than the 16/32 MiB defaults.
    block_bytes = 2 * (N * C * 2 + 3 * C * C * 2 + C * C * 2 + C * 4
                       + TQ * C * 4 + num_heads * TQ * N * 4)
    scratch_bytes = 3 * num_heads * N * dh * 2
    vmem_limit = int(min(60 * 2 ** 20,
                         max(32 * 2 ** 20, 2 * (block_bytes + scratch_bytes))))

    out, attn = pl.pallas_call(
        kernel,
        out_shape=(
            jax.ShapeDtypeStruct((B, N, C), jnp.float32),
            jax.ShapeDtypeStruct((B, num_heads, N, N), jnp.float32),
        ),
        grid_spec=pltpu.PrefetchScalarGridSpec(
            num_scalar_prefetch=0,
            grid=(B, nq),
            in_specs=[
                pl.BlockSpec((1, N, C), lambda b, q: (b, 0, 0)),              # x (full seq per batch)
                pl.BlockSpec((C, 3 * C), lambda b, q: (0, 0)),                # qkv weight (resident)
                pl.BlockSpec((num_heads, dh, C), lambda b, q: (0, 0, 0)),     # proj weight (resident)
                pl.BlockSpec((1, C), lambda b, q: (0, 0)),                    # proj bias
            ],
            out_specs=[
                pl.BlockSpec((1, TQ, C), lambda b, q: (b, q, 0)),
                pl.BlockSpec((1, num_heads, TQ, N), lambda b, q: (b, 0, q, 0)),
            ],
            scratch_shapes=[
                pltpu.VMEM((num_heads, N, dh), jnp.bfloat16),   # q (pre-scaled)
                pltpu.VMEM((num_heads, N, dh), jnp.bfloat16),   # k
                pltpu.VMEM((num_heads, N, dh), jnp.bfloat16),   # v
            ],
        ),
        compiler_params=pltpu.CompilerParams(
            dimension_semantics=("parallel", "arbitrary"),
            vmem_limit_bytes=vmem_limit,
        ),
        cost_estimate=cost,
    )(x_bf, w_qkv_t, w_proj_r, b_proj2d)
    return out, attn


def attention_reference(x, w_qkv, w_proj, b_proj, num_heads):
    """Pure-JAX f32 replica of the PyTorch forward, for verification."""
    B, N, C = x.shape
    dh = C // num_heads
    scale = dh ** (-0.5)
    qkv = x @ w_qkv.T                                     # (B, N, 3C)
    qkv = qkv.reshape(B, N, 3, num_heads, dh).transpose(2, 0, 3, 1, 4)
    q, k, v = qkv[0], qkv[1], qkv[2]                      # (B, H, N, dh)
    attn = (q @ jnp.swapaxes(k, -2, -1)) * scale          # (B, H, N, N)
    attn = jax.nn.softmax(attn, axis=-1)
    out = (attn @ v).transpose(0, 2, 1, 3).reshape(B, N, C)
    out = out @ w_proj.T + b_proj
    return out, attn


if __name__ == "__main__":
    B, N, C, H = 2, 8, 64, 8

    key = jax.random.PRNGKey(0)
    kx, kw1, kw2, kb = jax.random.split(key, 4)

    x = jax.random.normal(kx, (B, N, C), dtype=jnp.float32)
    w_qkv = 0.05 * jax.random.normal(kw1, (3 * C, C), dtype=jnp.float32)   # nn.Linear(dim, 3*dim, bias=False)
    w_proj = 0.05 * jax.random.normal(kw2, (C, C), dtype=jnp.float32)      # nn.Linear(dim, dim)
    b_proj = 0.01 * jax.random.normal(kb, (C,), dtype=jnp.float32)

    out, attn = attention_forward(x, w_qkv, w_proj, b_proj, num_heads=H)
    out = jax.block_until_ready(out)
    attn = jax.block_until_ready(attn)

    out_ref, attn_ref = attention_reference(x, w_qkv, w_proj, b_proj, num_heads=H)

    assert out.shape == (B, N, C) and attn.shape == (B, H, N, N)
    # bf16 MXU operands with f32 accumulation -> compare against the f32
    # reference with a bf16-appropriate tolerance.
    assert jnp.allclose(attn, attn_ref, atol=2e-2, rtol=2e-2), \
        float(jnp.max(jnp.abs(attn - attn_ref)))
    assert jnp.allclose(out, out_ref, atol=2e-2, rtol=2e-2), \
        float(jnp.max(jnp.abs(out - out_ref)))

    print("KERNEL_OK")
</pallas_src>

<mosaic_0001>
module attributes {stable_mosaic.version = 11 : i64} {
  func.func @_attention_kernel(%arg0: i32, %arg1: i32, %arg2: memref<1x8x64xbf16, #tpu.memory_space<vmem>>, %arg3: memref<64x192xbf16, #tpu.memory_space<vmem>>, %arg4: memref<8x8x64xbf16, #tpu.memory_space<vmem>>, %arg5: memref<1x64xf32, #tpu.memory_space<vmem>>, %arg6: memref<1x8x64xf32, #tpu.memory_space<vmem>>, %arg7: memref<1x8x8x8xf32, #tpu.memory_space<vmem>>, %arg8: memref<8x8x8xbf16, #tpu.memory_space<vmem>>, %arg9: memref<8x8x8xbf16, #tpu.memory_space<vmem>>, %arg10: memref<8x8x8xbf16, #tpu.memory_space<vmem>>) attributes {dimension_semantics = [#tpu.dimension_semantics<parallel>, #tpu.dimension_semantics<arbitrary>], iteration_bounds = array<i64: 2, 1>, scalar_prefetch = 0 : i64, scratch_operands = 3 : i64, tpu.core_type = #tpu.core_type<tc>, window_params = [{transform_indices = @transform_0, window_bounds = array<i64: 1, 8, 64>}, {pipeline_mode = #tpu.pipeline_mode<synchronous>, transform_indices = @transform_1, window_bounds = array<i64: 64, 192>}, {pipeline_mode = #tpu.pipeline_mode<synchronous>, transform_indices = @transform_2, window_bounds = array<i64: 8, 8, 64>}, {pipeline_mode = #tpu.pipeline_mode<synchronous>, transform_indices = @transform_3, window_bounds = array<i64: 1, 64>}, {transform_indices = @transform_4, window_bounds = array<i64: 1, 8, 64>}, {transform_indices = @transform_5, window_bounds = array<i64: 1, 8, 8, 8>}]} {
    %c0_i32 = arith.constant 0 : i32
    %0 = arith.cmpi eq, %arg1, %c0_i32 : i32
    %1 = arith.extui %0 : i1 to i32
    %c0_i32_0 = arith.constant 0 : i32
    %2 = arith.cmpi ne, %1, %c0_i32_0 : i32
    scf.if %2 {
      %c0_25 = arith.constant 0 : index
      %c0_26 = arith.constant 0 : index
      %c0_27 = arith.constant 0 : index
      %37 = vector.load %arg2[%c0_25, %c0_26, %c0_27] : memref<1x8x64xbf16, #tpu.memory_space<vmem>>, vector<1x8x64xbf16>
      %38 = vector.shape_cast %37 : vector<1x8x64xbf16> to vector<8x64xbf16>
      %c0_28 = arith.constant 0 : index
      %c0_29 = arith.constant 0 : index
      %39 = vector.load %arg3[%c0_28, %c0_29] : memref<64x192xbf16, #tpu.memory_space<vmem>>, vector<64x192xbf16>
      %cst_30 = arith.constant dense<0.000000e+00> : vector<8x192xf32>
      %40 = tpu.matmul %38, %39, %cst_30 {dimension_numbers = #tpu.dot_dimension_numbers<[1], [0], [0], [1], [0, 0, 1, 1], [], []>} : vector<8x64xbf16>, vector<64x192xbf16>, vector<8x192xf32> -> vector<8x192xf32>
      %41 = vector.extract_strided_slice %40 {offsets = [0, 0], sizes = [8, 64], strides = [1, 1]} : vector<8x192xf32> to vector<8x64xf32>
      %cst_31 = arith.constant 0.353553385 : f32
      %42 = vector.broadcast %cst_31 : f32 to vector<8x64xf32>
      %43 = arith.mulf %41, %42 : vector<8x64xf32>
      %44 = vector.extract_strided_slice %40 {offsets = [0, 64], sizes = [8, 64], strides = [1, 1]} : vector<8x192xf32> to vector<8x64xf32>
      %45 = vector.extract_strided_slice %40 {offsets = [0, 128], sizes = [8, 64], strides = [1, 1]} : vector<8x192xf32> to vector<8x64xf32>
      %46 = vector.extract_strided_slice %43 {offsets = [0, 0], sizes = [8, 8], strides = [1, 1]} : vector<8x64xf32> to vector<8x8xf32>
      %47 = arith.truncf %46 : vector<8x8xf32> to vector<8x8xbf16>
      %c0_32 = arith.constant 0 : index
      %c0_33 = arith.constant 0 : index
      %c0_34 = arith.constant 0 : index
      %48 = vector.load %arg8[%c0_32, %c0_33, %c0_34] : memref<8x8x8xbf16, #tpu.memory_space<vmem>>, vector<1x8x8xbf16>
      %49 = vector.shape_cast %48 : vector<1x8x8xbf16> to vector<8x8xbf16>
      %50 = vector.shape_cast %47 : vector<8x8xbf16> to vector<1x8x8xbf16>
      tpu.vector_store %arg8[%c0_32, %c0_33, %c0_34], %50 {strides = array<i32>} : memref<8x8x8xbf16, #tpu.memory_space<vmem>>, vector<1x8x8xbf16>,
      %51 = vector.extract_strided_slice %44 {offsets = [0, 0], sizes = [8, 8], strides = [1, 1]} : vector<8x64xf32> to vector<8x8xf32>
      %52 = arith.truncf %51 : vector<8x8xf32> to vector<8x8xbf16>
      %c0_35 = arith.constant 0 : index
      %c0_36 = arith.constant 0 : index
      %c0_37 = arith.constant 0 : index
      %53 = vector.load %arg9[%c0_35, %c0_36, %c0_37] : memref<8x8x8xbf16, #tpu.memory_space<vmem>>, vector<1x8x8xbf16>
      %54 = vector.shape_cast %53 : vector<1x8x8xbf16> to vector<8x8xbf16>
      %55 = vector.shape_cast %52 : vector<8x8xbf16> to vector<1x8x8xbf16>
      tpu.vector_store %arg9[%c0_35, %c0_36, %c0_37], %55 {strides = array<i32>} : memref<8x8x8xbf16, #tpu.memory_space<vmem>>, vector<1x8x8xbf16>,
      %56 = vector.extract_strided_slice %45 {offsets = [0, 0], sizes = [8, 8], strides = [1, 1]} : vector<8x64xf32> to vector<8x8xf32>
      %57 = arith.truncf %56 : vector<8x8xf32> to vector<8x8xbf16>
      %c0_38 = arith.constant 0 : index
      %c0_39 = arith.constant 0 : index
      %c0_40 = arith.constant 0 : index
      %58 = vector.load %arg10[%c0_38, %c0_39, %c0_40] : memref<8x8x8xbf16, #tpu.memory_space<vmem>>, vector<1x8x8xbf16>
      %59 = vector.shape_cast %58 : vector<1x8x8xbf16> to vector<8x8xbf16>
      %60 = vector.shape_cast %57 : vector<8x8xbf16> to vector<1x8x8xbf16>
      tpu.vector_store %arg10[%c0_38, %c0_39, %c0_40], %60 {strides = array<i32>} : memref<8x8x8xbf16, #tpu.memory_space<vmem>>, vector<1x8x8xbf16>,
      %61 = vector.extract_strided_slice %43 {offsets = [0, 8], sizes = [8, 8], strides = [1, 1]} : vector<8x64xf32> to vector<8x8xf32>
      %62 = arith.truncf %61 : vector<8x8xf32> to vector<8x8xbf16>
      %c1 = arith.constant 1 : index
      %c0_41 = arith.constant 0 : index
      %c0_42 = arith.constant 0 : index
      %63 = vector.load %arg8[%c1, %c0_41, %c0_42] : memref<8x8x8xbf16, #tpu.memory_space<vmem>>, vector<1x8x8xbf16>
      %64 = vector.shape_cast %63 : vector<1x8x8xbf16> to vector<8x8xbf16>
      %65 = vector.shape_cast %62 : vector<8x8xbf16> to vector<1x8x8xbf16>
      tpu.vector_store %arg8[%c1, %c0_41, %c0_42], %65 {strides = array<i32>} : memref<8x8x8xbf16, #tpu.memory_space<vmem>>, vector<1x8x8xbf16>,
      %66 = vector.extract_strided_slice %44 {offsets = [0, 8], sizes = [8, 8], strides = [1, 1]} : vector<8x64xf32> to vector<8x8xf32>
      %67 = arith.truncf %66 : vector<8x8xf32> to vector<8x8xbf16>
      %c1_43 = arith.constant 1 : index
      %c0_44 = arith.constant 0 : index
      %c0_45 = arith.constant 0 : index
      %68 = vector.load %arg9[%c1_43, %c0_44, %c0_45] : memref<8x8x8xbf16, #tpu.memory_space<vmem>>, vector<1x8x8xbf16>
      %69 = vector.shape_cast %68 : vector<1x8x8xbf16> to vector<8x8xbf16>
      %70 = vector.shape_cast %67 : vector<8x8xbf16> to vector<1x8x8xbf16>
      tpu.vector_store %arg9[%c1_43, %c0_44, %c0_45], %70 {strides = array<i32>} : memref<8x8x8xbf16, #tpu.memory_space<vmem>>, vector<1x8x8xbf16>,
      %71 = vector.extract_strided_slice %45 {offsets = [0, 8], sizes = [8, 8], strides = [1, 1]} : vector<8x64xf32> to vector<8x8xf32>
      %72 = arith.truncf %71 : vector<8x8xf32> to vector<8x8xbf16>
      %c1_46 = arith.constant 1 : index
      %c0_47 = arith.constant 0 : index
      %c0_48 = arith.constant 0 : index
      %73 = vector.load %arg10[%c1_46, %c0_47, %c0_48] : memref<8x8x8xbf16, #tpu.memory_space<vmem>>, vector<1x8x8xbf16>
      %74 = vector.shape_cast %73 : vector<1x8x8xbf16> to vector<8x8xbf16>
      %75 = vector.shape_cast %72 : vector<8x8xbf16> to vector<1x8x8xbf16>
      tpu.vector_store %arg10[%c1_46, %c0_47, %c0_48], %75 {strides = array<i32>} : memref<8x8x8xbf16, #tpu.memory_space<vmem>>, vector<1x8x8xbf16>,
      %76 = vector.extract_strided_slice %43 {offsets = [0, 16], sizes = [8, 8], strides = [1, 1]} : vector<8x64xf32> to vector<8x8xf32>
      %77 = arith.truncf %76 : vector<8x8xf32> to vector<8x8xbf16>
      %c2 = arith.constant 2 : index
      %c0_49 = arith.constant 0 : index
      %c0_50 = arith.constant 0 : index
      %78 = vector.load %arg8[%c2, %c0_49, %c0_50] : memref<8x8x8xbf16, #tpu.memory_space<vmem>>, vector<1x8x8xbf16>
      %79 = vector.shape_cast %78 : vector<1x8x8xbf16> to vector<8x8xbf16>
      %80 = vector.shape_cast %77 : vector<8x8xbf16> to vector<1x8x8xbf16>
      tpu.vector_store %arg8[%c2, %c0_49, %c0_50], %80 {strides = array<i32>} : memref<8x8x8xbf16, #tpu.memory_space<vmem>>, vector<1x8x8xbf16>,
      %81 = vector.extract_strided_slice %44 {offsets = [0, 16], sizes = [8, 8], strides = [1, 1]} : vector<8x64xf32> to vector<8x8xf32>
      %82 = arith.truncf %81 : vector<8x8xf32> to vector<8x8xbf16>
      %c2_51 = arith.constant 2 : index
      %c0_52 = arith.constant 0 : index
      %c0_53 = arith.constant 0 : index
      %83 = vector.load %arg9[%c2_51, %c0_52, %c0_53] : memref<8x8x8xbf16, #tpu.memory_space<vmem>>, vector<1x8x8xbf16>
      %84 = vector.shape_cast %83 : vector<1x8x8xbf16> to vector<8x8xbf16>
      %85 = vector.shape_cast %82 : vector<8x8xbf16> to vector<1x8x8xbf16>
      tpu.vector_store %arg9[%c2_51, %c0_52, %c0_53], %85 {strides = array<i32>} : memref<8x8x8xbf16, #tpu.memory_space<vmem>>, vector<1x8x8xbf16>,
      %86 = vector.extract_strided_slice %45 {offsets = [0, 16], sizes = [8, 8], strides = [1, 1]} : vector<8x64xf32> to vector<8x8xf32>
      %87 = arith.truncf %86 : vector<8x8xf32> to vector<8x8xbf16>
      %c2_54 = arith.constant 2 : index
      %c0_55 = arith.constant 0 : index
      %c0_56 = arith.constant 0 : index
      %88 = vector.load %arg10[%c2_54, %c0_55, %c0_56] : memref<8x8x8xbf16, #tpu.memory_space<vmem>>, vector<1x8x8xbf16>
      %89 = vector.shape_cast %88 : vector<1x8x8xbf16> to vector<8x8xbf16>
      %90 = vector.shape_cast %87 : vector<8x8xbf16> to vector<1x8x8xbf16>
      tpu.vector_store %arg10[%c2_54, %c0_55, %c0_56], %90 {strides = array<i32>} : memref<8x8x8xbf16, #tpu.memory_space<vmem>>, vector<1x8x8xbf16>,
      %91 = vector.extract_strided_slice %43 {offsets = [0, 24], sizes = [8, 8], strides = [1, 1]} : vector<8x64xf32> to vector<8x8xf32>
      %92 = arith.truncf %91 : vector<8x8xf32> to vector<8x8xbf16>
      %c3 = arith.constant 3 : index
      %c0_57 = arith.constant 0 : index
      %c0_58 = arith.constant 0 : index
      %93 = vector.load %arg8[%c3, %c0_57, %c0_58] : memref<8x8x8xbf16, #tpu.memory_space<vmem>>, vector<1x8x8xbf16>
      %94 = vector.shape_cast %93 : vector<1x8x8xbf16> to vector<8x8xbf16>
      %95 = vector.shape_cast %92 : vector<8x8xbf16> to vector<1x8x8xbf16>
      tpu.vector_store %arg8[%c3, %c0_57, %c0_58], %95 {strides = array<i32>} : memref<8x8x8xbf16, #tpu.memory_space<vmem>>, vector<1x8x8xbf16>,
      %96 = vector.extract_strided_slice %44 {offsets = [0, 24], sizes = [8, 8], strides = [1, 1]} : vector<8x64xf32> to vector<8x8xf32>
      %97 = arith.truncf %96 : vector<8x8xf32> to vector<8x8xbf16>
      %c3_59 = arith.constant 3 : index
      %c0_60 = arith.constant 0 : index
      %c0_61 = arith.constant 0 : index
      %98 = vector.load %arg9[%c3_59, %c0_60, %c0_61] : memref<8x8x8xbf16, #tpu.memory_space<vmem>>, vector<1x8x8xbf16>
      %99 = vector.shape_cast %98 : vector<1x8x8xbf16> to vector<8x8xbf16>
      %100 = vector.shape_cast %97 : vector<8x8xbf16> to vector<1x8x8xbf16>
      tpu.vector_store %arg9[%c3_59, %c0_60, %c0_61], %100 {strides = array<i32>} : memref<8x8x8xbf16, #tpu.memory_space<vmem>>, vector<1x8x8xbf16>,
      %101 = vector.extract_strided_slice %45 {offsets = [0, 24], sizes = [8, 8], strides = [1, 1]} : vector<8x64xf32> to vector<8x8xf32>
      %102 = arith.truncf %101 : vector<8x8xf32> to vector<8x8xbf16>
      %c3_62 = arith.constant 3 : index
      %c0_63 = arith.constant 0 : index
      %c0_64 = arith.constant 0 : index
      %103 = vector.load %arg10[%c3_62, %c0_63, %c0_64] : memref<8x8x8xbf16, #tpu.memory_space<vmem>>, vector<1x8x8xbf16>
      %104 = vector.shape_cast %103 : vector<1x8x8xbf16> to vector<8x8xbf16>
      %105 = vector.shape_cast %102 : vector<8x8xbf16> to vector<1x8x8xbf16>
      tpu.vector_store %arg10[%c3_62, %c0_63, %c0_64], %105 {strides = array<i32>} : memref<8x8x8xbf16, #tpu.memory_space<vmem>>, vector<1x8x8xbf16>,
      %106 = vector.extract_strided_slice %43 {offsets = [0, 32], sizes = [8, 8], strides = [1, 1]} : vector<8x64xf32> to vector<8x8xf32>
      %107 = arith.truncf %106 : vector<8x8xf32> to vector<8x8xbf16>
      %c4 = arith.constant 4 : index
      %c0_65 = arith.constant 0 : index
      %c0_66 = arith.constant 0 : index
      %108 = vector.load %arg8[%c4, %c0_65, %c0_66] : memref<8x8x8xbf16, #tpu.memory_space<vmem>>, vector<1x8x8xbf16>
      %109 = vector.shape_cast %108 : vector<1x8x8xbf16> to vector<8x8xbf16>
      %110 = vector.shape_cast %107 : vector<8x8xbf16> to vector<1x8x8xbf16>
      tpu.vector_store %arg8[%c4, %c0_65, %c0_66], %110 {strides = array<i32>} : memref<8x8x8xbf16, #tpu.memory_space<vmem>>, vector<1x8x8xbf16>,
      %111 = vector.extract_strided_slice %44 {offsets = [0, 32], sizes = [8, 8], strides = [1, 1]} : vector<8x64xf32> to vector<8x8xf32>
      %112 = arith.truncf %111 : vector<8x8xf32> to vector<8x8xbf16>
      %c4_67 = arith.constant 4 : index
      %c0_68 = arith.constant 0 : index
      %c0_69 = arith.constant 0 : index
      %113 = vector.load %arg9[%c4_67, %c0_68, %c0_69] : memref<8x8x8xbf16, #tpu.memory_space<vmem>>, vector<1x8x8xbf16>
      %114 = vector.shape_cast %113 : vector<1x8x8xbf16> to vector<8x8xbf16>
      %115 = vector.shape_cast %112 : vector<8x8xbf16> to vector<1x8x8xbf16>
      tpu.vector_store %arg9[%c4_67, %c0_68, %c0_69], %115 {strides = array<i32>} : memref<8x8x8xbf16, #tpu.memory_space<vmem>>, vector<1x8x8xbf16>,
      %116 = vector.extract_strided_slice %45 {offsets = [0, 32], sizes = [8, 8], strides = [1, 1]} : vector<8x64xf32> to vector<8x8xf32>
      %117 = arith.truncf %116 : vector<8x8xf32> to vector<8x8xbf16>
      %c4_70 = arith.constant 4 : index
      %c0_71 = arith.constant 0 : index
      %c0_72 = arith.constant 0 : index
      %118 = vector.load %arg10[%c4_70, %c0_71, %c0_72] : memref<8x8x8xbf16, #tpu.memory_space<vmem>>, vector<1x8x8xbf16>
      %119 = vector.shape_cast %118 : vector<1x8x8xbf16> to vector<8x8xbf16>
      %120 = vector.shape_cast %117 : vector<8x8xbf16> to vector<1x8x8xbf16>
      tpu.vector_store %arg10[%c4_70, %c0_71, %c0_72], %120 {strides = array<i32>} : memref<8x8x8xbf16, #tpu.memory_space<vmem>>, vector<1x8x8xbf16>,
      %121 = vector.extract_strided_slice %43 {offsets = [0, 40], sizes = [8, 8], strides = [1, 1]} : vector<8x64xf32> to vector<8x8xf32>
      %122 = arith.truncf %121 : vector<8x8xf32> to vector<8x8xbf16>
      %c5 = arith.constant 5 : index
      %c0_73 = arith.constant 0 : index
      %c0_74 = arith.constant 0 : index
      %123 = vector.load %arg8[%c5, %c0_73, %c0_74] : memref<8x8x8xbf16, #tpu.memory_space<vmem>>, vector<1x8x8xbf16>
      %124 = vector.shape_cast %123 : vector<1x8x8xbf16> to vector<8x8xbf16>
      %125 = vector.shape_cast %122 : vector<8x8xbf16> to vector<1x8x8xbf16>
      tpu.vector_store %arg8[%c5, %c0_73, %c0_74], %125 {strides = array<i32>} : memref<8x8x8xbf16, #tpu.memory_space<vmem>>, vector<1x8x8xbf16>,
      %126 = vector.extract_strided_slice %44 {offsets = [0, 40], sizes = [8, 8], strides = [1, 1]} : vector<8x64xf32> to vector<8x8xf32>
      %127 = arith.truncf %126 : vector<8x8xf32> to vector<8x8xbf16>
      %c5_75 = arith.constant 5 : index
      %c0_76 = arith.constant 0 : index
      %c0_77 = arith.constant 0 : index
      %128 = vector.load %arg9[%c5_75, %c0_76, %c0_77] : memref<8x8x8xbf16, #tpu.memory_space<vmem>>, vector<1x8x8xbf16>
      %129 = vector.shape_cast %128 : vector<1x8x8xbf16> to vector<8x8xbf16>
      %130 = vector.shape_cast %127 : vector<8x8xbf16> to vector<1x8x8xbf16>
      tpu.vector_store %arg9[%c5_75, %c0_76, %c0_77], %130 {strides = array<i32>} : memref<8x8x8xbf16, #tpu.memory_space<vmem>>, vector<1x8x8xbf16>,
      %131 = vector.extract_strided_slice %45 {offsets = [0, 40], sizes = [8, 8], strides = [1, 1]} : vector<8x64xf32> to vector<8x8xf32>
      %132 = arith.truncf %131 : vector<8x8xf32> to vector<8x8xbf16>
      %c5_78 = arith.constant 5 : index
      %c0_79 = arith.constant 0 : index
      %c0_80 = arith.constant 0 : index
      %133 = vector.load %arg10[%c5_78, %c0_79, %c0_80] : memref<8x8x8xbf16, #tpu.memory_space<vmem>>, vector<1x8x8xbf16>
      %134 = vector.shape_cast %133 : vector<1x8x8xbf16> to vector<8x8xbf16>
      %135 = vector.shape_cast %132 : vector<8x8xbf16> to vector<1x8x8xbf16>
      tpu.vector_store %arg10[%c5_78, %c0_79, %c0_80], %135 {strides = array<i32>} : memref<8x8x8xbf16, #tpu.memory_space<vmem>>, vector<1x8x8xbf16>,
      %136 = vector.extract_strided_slice %43 {offsets = [0, 48], sizes = [8, 8], strides = [1, 1]} : vector<8x64xf32> to vector<8x8xf32>
      %137 = arith.truncf %136 : vector<8x8xf32> to vector<8x8xbf16>
      %c6 = arith.constant 6 : index
      %c0_81 = arith.constant 0 : index
      %c0_82 = arith.constant 0 : index
      %138 = vector.load %arg8[%c6, %c0_81, %c0_82] : memref<8x8x8xbf16, #tpu.memory_space<vmem>>, vector<1x8x8xbf16>
      %139 = vector.shape_cast %138 : vector<1x8x8xbf16> to vector<8x8xbf16>
      %140 = vector.shape_cast %137 : vector<8x8xbf16> to vector<1x8x8xbf16>
      tpu.vector_store %arg8[%c6, %c0_81, %c0_82], %140 {strides = array<i32>} : memref<8x8x8xbf16, #tpu.memory_space<vmem>>, vector<1x8x8xbf16>,
      %141 = vector.extract_strided_slice %44 {offsets = [0, 48], sizes = [8, 8], strides = [1, 1]} : vector<8x64xf32> to vector<8x8xf32>
      %142 = arith.truncf %141 : vector<8x8xf32> to vector<8x8xbf16>
      %c6_83 = arith.constant 6 : index
      %c0_84 = arith.constant 0 : index
      %c0_85 = arith.constant 0 : index
      %143 = vector.load %arg9[%c6_83, %c0_84, %c0_85] : memref<8x8x8xbf16, #tpu.memory_space<vmem>>, vector<1x8x8xbf16>
      %144 = vector.shape_cast %143 : vector<1x8x8xbf16> to vector<8x8xbf16>
      %145 = vector.shape_cast %142 : vector<8x8xbf16> to vector<1x8x8xbf16>
      tpu.vector_store %arg9[%c6_83, %c0_84, %c0_85], %145 {strides = array<i32>} : memref<8x8x8xbf16, #tpu.memory_space<vmem>>, vector<1x8x8xbf16>,
      %146 = vector.extract_strided_slice %45 {offsets = [0, 48], sizes = [8, 8], strides = [1, 1]} : vector<8x64xf32> to vector<8x8xf32>
      %147 = arith.truncf %146 : vector<8x8xf32> to vector<8x8xbf16>
      %c6_86 = arith.constant 6 : index
      %c0_87 = arith.constant 0 : index
      %c0_88 = arith.constant 0 : index
      %148 = vector.load %arg10[%c6_86, %c0_87, %c0_88] : memref<8x8x8xbf16, #tpu.memory_space<vmem>>, vector<1x8x8xbf16>
      %149 = vector.shape_cast %148 : vector<1x8x8xbf16> to vector<8x8xbf16>
      %150 = vector.shape_cast %147 : vector<8x8xbf16> to vector<1x8x8xbf16>
      tpu.vector_store %arg10[%c6_86, %c0_87, %c0_88], %150 {strides = array<i32>} : memref<8x8x8xbf16, #tpu.memory_space<vmem>>, vector<1x8x8xbf16>,
      %151 = vector.extract_strided_slice %43 {offsets = [0, 56], sizes = [8, 8], strides = [1, 1]} : vector<8x64xf32> to vector<8x8xf32>
      %152 = arith.truncf %151 : vector<8x8xf32> to vector<8x8xbf16>
      %c7 = arith.constant 7 : index
      %c0_89 = arith.constant 0 : index
      %c0_90 = arith.constant 0 : index
      %153 = vector.load %arg8[%c7, %c0_89, %c0_90] : memref<8x8x8xbf16, #tpu.memory_space<vmem>>, vector<1x8x8xbf16>
      %154 = vector.shape_cast %153 : vector<1x8x8xbf16> to vector<8x8xbf16>
      %155 = vector.shape_cast %152 : vector<8x8xbf16> to vector<1x8x8xbf16>
      tpu.vector_store %arg8[%c7, %c0_89, %c0_90], %155 {strides = array<i32>} : memref<8x8x8xbf16, #tpu.memory_space<vmem>>, vector<1x8x8xbf16>,
      %156 = vector.extract_strided_slice %44 {offsets = [0, 56], sizes = [8, 8], strides = [1, 1]} : vector<8x64xf32> to vector<8x8xf32>
      %157 = arith.truncf %156 : vector<8x8xf32> to vector<8x8xbf16>
      %c7_91 = arith.constant 7 : index
      %c0_92 = arith.constant 0 : index
      %c0_93 = arith.constant 0 : index
      %158 = vector.load %arg9[%c7_91, %c0_92, %c0_93] : memref<8x8x8xbf16, #tpu.memory_space<vmem>>, vector<1x8x8xbf16>
      %159 = vector.shape_cast %158 : vector<1x8x8xbf16> to vector<8x8xbf16>
      %160 = vector.shape_cast %157 : vector<8x8xbf16> to vector<1x8x8xbf16>
      tpu.vector_store %arg9[%c7_91, %c0_92, %c0_93], %160 {strides = array<i32>} : memref<8x8x8xbf16, #tpu.memory_space<vmem>>, vector<1x8x8xbf16>,
      %161 = vector.extract_strided_slice %45 {offsets = [0, 56], sizes = [8, 8], strides = [1, 1]} : vector<8x64xf32> to vector<8x8xf32>
      %162 = arith.truncf %161 : vector<8x8xf32> to vector<8x8xbf16>
      %c7_94 = arith.constant 7 : index
      %c0_95 = arith.constant 0 : index
      %c0_96 = arith.constant 0 : index
      %163 = vector.load %arg10[%c7_94, %c0_95, %c0_96] : memref<8x8x8xbf16, #tpu.memory_space<vmem>>, vector<1x8x8xbf16>
      %164 = vector.shape_cast %163 : vector<1x8x8xbf16> to vector<8x8xbf16>
      %165 = vector.shape_cast %162 : vector<8x8xbf16> to vector<1x8x8xbf16>
      tpu.vector_store %arg10[%c7_94, %c0_95, %c0_96], %165 {strides = array<i32>} : memref<8x8x8xbf16, #tpu.memory_space<vmem>>, vector<1x8x8xbf16>,
    } else {
    }
    %c8_i32 = arith.constant 8 : i32
    %3 = arith.muli %arg1, %c8_i32 : i32
    %4 = tpu.assume_multiple %3, 8 : i32
    %c0 = arith.constant 0 : index
    %5 = arith.index_cast %4 : i32 to index
    %c0_1 = arith.constant 0 : index
    %6 = vector.load %arg8[%c0, %5, %c0_1] : memref<8x8x8xbf16, #tpu.memory_space<vmem>>, vector<8x8x8xbf16>
    %c0_2 = arith.constant 0 : index
    %c0_3 = arith.constant 0 : index
    %c0_4 = arith.constant 0 : index
    %7 = vector.load %arg9[%c0_2, %c0_3, %c0_4] : memref<8x8x8xbf16, #tpu.memory_space<vmem>>, vector<8x8x8xbf16>
    "tpu.trace_start"() <{level = 10 : i32, message = "hqd,hkd->hqk"}> : () -> ()
    %cst = arith.constant dense<0.000000e+00> : vector<8x8x8xf32>
    %8 = tpu.matmul %6, %7, %cst {dimension_numbers = #tpu.dot_dimension_numbers<[2], [2], [1], [1], [0, 0, 0, 1, 1, 1], [0], [0]>} : vector<8x8x8xbf16>, vector<8x8x8xbf16>, vector<8x8x8xf32> -> vector<8x8x8xf32>
    "tpu.trace_stop"() : () -> ()
    %cst_5 = arith.constant dense<0xFF800000> : vector<8x8xf32>
    %9 = vector.multi_reduction <maximumf>, %8, %cst_5 [2] : vector<8x8x8xf32> to vector<8x8xf32>
    %10 = vector.shape_cast %9 : vector<8x8xf32> to vector<8x8x1xf32>
    %11 = vector.broadcast %10 : vector<8x8x1xf32> to vector<8x8x8xf32>
    %12 = arith.subf %8, %11 : vector<8x8x8xf32>
    %13 = math.exp %12 : vector<8x8x8xf32>
    %cst_6 = arith.constant dense<0.000000e+00> : vector<8x8xf32>
    %14 = vector.multi_reduction <add>, %13, %cst_6 [2] : vector<8x8x8xf32> to vector<8x8xf32>
    %15 = vector.shape_cast %14 : vector<8x8xf32> to vector<8x8x1xf32>
    %16 = tpu.reciprocal %15 {approx = true} : vector<8x8x1xf32> -> vector<8x8x1xf32>
    %17 = vector.broadcast %16 : vector<8x8x1xf32> to vector<8x8x8xf32>
    %18 = arith.mulf %13, %17 : vector<8x8x8xf32>
    %c0_7 = arith.constant 0 : index
    %c0_8 = arith.constant 0 : index
    %c0_9 = arith.constant 0 : index
    %c0_10 = arith.constant 0 : index
    %19 = vector.load %arg7[%c0_7, %c0_8, %c0_9, %c0_10] : memref<1x8x8x8xf32, #tpu.memory_space<vmem>>, vector<1x8x8x8xf32>
    %20 = vector.shape_cast %19 : vector<1x8x8x8xf32> to vector<8x8x8xf32>
    %21 = vector.shape_cast %18 : vector<8x8x8xf32> to vector<1x8x8x8xf32>
    tpu.vector_store %arg7[%c0_7, %c0_8, %c0_9, %c0_10], %21 {strides = array<i32>} : memref<1x8x8x8xf32, #tpu.memory_space<vmem>>, vector<1x8x8x8xf32>,
    %22 = arith.truncf %18 : vector<8x8x8xf32> to vector<8x8x8xbf16>
    %c0_11 = arith.constant 0 : index
    %c0_12 = arith.constant 0 : index
    %c0_13 = arith.constant 0 : index
    %23 = vector.load %arg10[%c0_11, %c0_12, %c0_13] : memref<8x8x8xbf16, #tpu.memory_space<vmem>>, vector<8x8x8xbf16>
    "tpu.trace_start"() <{level = 10 : i32, message = "hqk,hkd->hqd"}> : () -> ()
    %cst_14 = arith.constant dense<0.000000e+00> : vector<8x8x8xf32>
    %24 = tpu.matmul %22, %23, %cst_14 {dimension_numbers = #tpu.dot_dimension_numbers<[2], [1], [1], [2], [0, 0, 0, 1, 1, 2], [0], [0]>} : vector<8x8x8xbf16>, vector<8x8x8xbf16>, vector<8x8x8xf32> -> vector<8x8x8xf32>
    "tpu.trace_stop"() : () -> ()
    %25 = arith.truncf %24 : vector<8x8x8xf32> to vector<8x8x8xbf16>
    %c0_15 = arith.constant 0 : index
    %c0_16 = arith.constant 0 : index
    %c0_17 = arith.constant 0 : index
    %26 = vector.load %arg4[%c0_15, %c0_16, %c0_17] : memref<8x8x64xbf16, #tpu.memory_space<vmem>>, vector<8x8x64xbf16>
    "tpu.trace_start"() <{level = 10 : i32, message = "hqd,hdc->hqc"}> : () -> ()
    %cst_18 = arith.constant dense<0.000000e+00> : vector<8x8x64xf32>
    %27 = tpu.matmul %25, %26, %cst_18 {dimension_numbers = #tpu.dot_dimension_numbers<[2], [1], [1], [2], [0, 0, 0, 1, 1, 2], [0], [0]>} : vector<8x8x8xbf16>, vector<8x8x64xbf16>, vector<8x8x64xf32> -> vector<8x8x64xf32>
    "tpu.trace_stop"() : () -> ()
    %cst_19 = arith.constant dense<0.000000e+00> : vector<8x64xf32>
    %28 = vector.multi_reduction <add>, %27, %cst_19 [0] : vector<8x8x64xf32> to vector<8x64xf32>
    %c0_20 = arith.constant 0 : index
    %c0_21 = arith.constant 0 : index
    %29 = vector.load %arg5[%c0_20, %c0_21] : memref<1x64xf32, #tpu.memory_space<vmem>>, vector<1x64xf32>
    %30 = vector.shape_cast %29 : vector<1x64xf32> to vector<64xf32>
    %31 = vector.shape_cast %30 : vector<64xf32> to vector<1x64xf32>
    %32 = vector.broadcast %31 : vector<1x64xf32> to vector<8x64xf32>
    %33 = arith.addf %28, %32 : vector<8x64xf32>
    %c0_22 = arith.constant 0 : index
    %c0_23 = arith.constant 0 : index
    %c0_24 = arith.constant 0 : index
    %34 = vector.load %arg6[%c0_22, %c0_23, %c0_24] : memref<1x8x64xf32, #tpu.memory_space<vmem>>, vector<1x8x64xf32>
    %35 = vector.shape_cast %34 : vector<1x8x64xf32> to vector<8x64xf32>
    %36 = vector.shape_cast %33 : vector<8x64xf32> to vector<1x8x64xf32>
    tpu.vector_store %arg6[%c0_22, %c0_23, %c0_24], %36 {strides = array<i32>} : memref<1x8x64xf32, #tpu.memory_space<vmem>>, vector<1x8x64xf32>,
    return
  }
  func.func @transform_0(%arg0: i32, %arg1: i32) -> (i32, i32, i32) {
    %c0_i32 = arith.constant 0 : i32
    %c0_i32_0 = arith.constant 0 : i32
    %c0_i32_1 = arith.constant 0 : i32
    return %arg0, %c0_i32, %c0_i32_0 : i32, i32, i32
  }
  func.func @transform_1(%arg0: i32, %arg1: i32) -> (i32, i32) {
    %c0_i32 = arith.constant 0 : i32
    %c0_i32_0 = arith.constant 0 : i32
    %c0_i32_1 = arith.constant 0 : i32
    return %c0_i32, %c0_i32_0 : i32, i32
  }
  func.func @transform_2(%arg0: i32, %arg1: i32) -> (i32, i32, i32) {
    %c0_i32 = arith.constant 0 : i32
    %c0_i32_0 = arith.constant 0 : i32
    %c0_i32_1 = arith.constant 0 : i32
    %c0_i32_2 = arith.constant 0 : i32
    return %c0_i32, %c0_i32_0, %c0_i32_1 : i32, i32, i32
  }
  func.func @transform_3(%arg0: i32, %arg1: i32) -> (i32, i32) {
    %c0_i32 = arith.constant 0 : i32
    %c0_i32_0 = arith.constant 0 : i32
    %c0_i32_1 = arith.constant 0 : i32
    return %c0_i32, %c0_i32_0 : i32, i32
  }
  func.func @transform_4(%arg0: i32, %arg1: i32) -> (i32, i32, i32) {
    %c0_i32 = arith.constant 0 : i32
    %c0_i32_0 = arith.constant 0 : i32
    return %arg0, %arg1, %c0_i32 : i32, i32, i32
  }
  func.func @transform_5(%arg0: i32, %arg1: i32) -> (i32, i32, i32, i32) {
    %c0_i32 = arith.constant 0 : i32
    %c0_i32_0 = arith.constant 0 : i32
    %c0_i32_1 = arith.constant 0 : i32
    return %arg0, %c0_i32, %arg1, %c0_i32_0 : i32, i32, i32, i32
  }
}

</mosaic_0001>

<bundles_post_ra>
// kernel: tpu_custom_call.1
= control target key start
LH: loop header
LB: loop body
LE: loop exit
PB: predicated region body
PF: predicated region fallthrough
CT: control target
= control target key end

     0   :  { %11 = vsyncpa [#allocation6], 0  ;;  %s2140_s0 = inlined_call_operand.hbm [shape: bf16[2,8,64], index: 0, kind: input, shape index: {}]   ;;  %s2141_s1 = inlined_call_operand.hbm [shape: bf16[64,192], index: 1, kind: input, shape index: {}]   ;;  %s2142_s2 = inlined_call_operand.hbm [shape: bf16[8,8,64], index: 2, kind: input, shape index: {}]   ;;  %s2143_s3 = inlined_call_operand.vmem [shape: f32[1,64], index: 3, kind: input, shape index: {}]   ;;  %s2144_s4 = inlined_call_operand.hbm [shape: f32[2,8,64], index: 4, kind: output, shape index: {0}]   ;;  %s2145_s5 = inlined_call_operand.hbm [shape: f32[2,8,8,8], index: 5, kind: output, shape index: {1}]  }
   0x1   :  { %13 = vsyncpa [#allocation6 + $0x1], 0 }
   0x2   :  { %14 = vsyncpa [#allocation9], 0 }
   0x3   :  { %15 = vsyncpa [#allocation7], 0 }
   0x4   :  { %17 = vsyncpa [#allocation7 + $0x1], 0 }
   0x5   :  { %18 = vsyncpa [#allocation13], 0 }
   0x6   :  { %20 = vsyncpa [#allocation13 + $0x1], 0  ;;  %s1800_s18 = smov 0   ;;  %s1802_s19 = smov 0  }
   0x7   :  { %s1804_s20 = smov 0   ;;  %s1806_s21 = smov 0  }
   0x8   :  { %s1808_s22 = smov 0   ;;  %s1810_s23 = smov 0  }
   0x9 LB: > { %s1309_s24 = sadd.s32 4294967295, %s1746_s23   ;;  %p1311_p0 = scmp.ge.s32.totalorder %s1746_s23, 1  ;;  %s1746_s23 = sphi %s1810_s23, %s26_s23   ;;  %s1742_s22 = sphi %s1808_s22, %s2157_s22   ;;  %s1738_s21 = sphi %s1806_s21, %s2156_s21   ;;  %s1734_s20 = sphi %s1804_s20, %s2155_s20   ;;  %s1730_s19 = sphi %s1802_s19, %s2154_s19   ;;  %s1726_s18 = sphi %s1800_s18, %s2153_s18  }
   0xa   : > { %p1834_p1 = scmp.eq.s32.totalorder %s1309_s24, 0  ;;  %p188_p2 = scmp.lt.s32.totalorder %s1746_s23, 3 }
   0xb   : > { %s199_s28 = sshll.u32 %s2141_s1, 4  ;;  %s1748_s30 = smov [#allocation8]   ;;  %s200_s28 = int_to_ptr.hbm [resolvable:$true] %s199_s28 }
   0xc   : > { %p1842_p3 = pnand %p1311_p0, %p188_p2  ;;  %s201_s6 = sshll.u32 %s1748_s30, 4  ;;  %s202_s6 = int_to_ptr.vmem [resolvable:$true] %s201_s6 }
   0xd   : > { %p1314_p6 = scmp.ge.s32.totalorder %s1746_s23, 2  ;;  %s213_s9 = sshll.u32 %s2142_s2, 4  ;;  %s214_s9 = int_to_ptr.hbm [resolvable:$true] %s213_s9 }
   0xe   : > { %p1411_p4 = pneg %p1842_p3  ;;  %s1749_s10 = smov 128  }
   0xf   : > { %s1750_s11 = smov 8   ;;  %s1751_s12 = smov [#allocation10]  }
  0x10   : > { %p1412_p5 = pnand %p1411_p4, %p1834_p1  ;;  %s215_s13 = sshll.u32 %s1751_s12, 4  ;;  %s216_s13 = int_to_ptr.vmem [resolvable:$true] %s215_s13 }
  0x11   : > { %s1752_s14 = smov 64   ;;  %s1753_s15 = smov 4  }
  0x12   : > { %1414 = dma.hbm_to_vmem [thread:$0]  (!%p1412_p5), %s200_s28, 1024, %s202_s6, [#allocation9], %s1749_s10, %s1749_s10, %s1750_s11  }
  0x13   : > { %1417 = dma.hbm_to_vmem [thread:$0]  (!%p1412_p5), %s214_s9, 512, %s216_s13, [#allocation9], %s1752_s14, %s1752_s14, %s1753_s15  }
  0x14   : > { %s38_s16 = sadd.s32 1, %s1742_s22  ;;  %s1310_s17 = sadd.s32 4294967294, %s1746_s23  }
  0x15   : > { %p40_p7 = scmp.ge.s32.totalorder %s38_s16, 2  ;;  %s45_s26 = sadd.s32 1, %s1734_s20 }
  0x16   : > { %p52_p8 = scmp.ne.s32.totalorder %s1734_s20, %s1730_s19  ;;  %p53_p9 = scmp.eq.s32.totalorder %s1746_s23, 0 }
  0x17   : > { %s2159_s16 = smov (%p40_p7, %s38_s16), 0  ;;  %p58_p10 = scmp.ne.s32.totalorder %s1730_s19, %s1726_s18 }
  0x18   : > { %s42_s27 = ssub.s32 %s1742_s22, %s2159_s16  ;;  %p147_p11 = scmp.eq.s32.totalorder %s1309_s24, 1 }
  0x19   : > { %p43_p12 = scmp.eq.s32.totalorder %s42_s27, 0  ;;  %p1870_p13 = por %p1834_p1, %p58_p10 }
  0x1a   : > { %p1874_p0 = por %p147_p11, %p52_p8  ;;  %p153_p2 = scmp.eq.s32.totalorder %s1310_s17, 1 }
  0x1b   : > { %s1879_s6 = scalar_select %p43_p12, %s1734_s20, %s45_s26  }
  0x1c   : > { %p54_p4 = por %p53_p9, %p52_p8  ;;  %p1881_p5 = por %p153_p2, %p58_p10 }
  0x1d   : > { %s232_s8 = sand.u32 1, %s1734_s20   ;;  %s1316_s24 = sshll.u32 %s1742_s22, 2 }
  0x1e   : > { %p1431_p7 = scmp.lt.s32.totalorder %s1746_s23, 2  ;;  %s1315_s9 = sshll.u32 %s232_s8, 2 }
  0x1f   : > { %s240_s12 = scalar_lea.hbm %s2140_s0, %s1316_s24  ;;  %s236_s14 = scalar_lea.vmem [#allocation5], %s1315_s9 }
  0x20   : > { %s242_s13 = sshll.u32 %s240_s12, 4  ;;  %s244_s15 = sshll.u32 %s236_s14, 4  ;;  %s243_s13 = int_to_ptr.hbm [resolvable:$true] %s242_s13  ;;  %s245_s15 = int_to_ptr.vmem [resolvable:$true] %s244_s15 }
  0x21   : > { %p1419_p11 = pnand %p1431_p7, %p54_p4  ;;  %s233_s17 = scalar_lea.sflag [#allocation6], %s232_s8 }
  0x22   : > { %253 = sbr.rel (%p1842_p3) target bundleno = 1090 (0x442), region = 36  ;;  %s1894_s26 = sand.u32 (!%p1842_p3), 1, %s1730_s19  }
  0x23   : > { %1421 = dma.hbm_to_vmem [thread:$0]  (!%p1419_p11), %s243_s13, 64, %s245_s15, %s233_s17  }
  0x24   : > { %s1318_s27 = sshll.u32 (!%p1842_p3), %s1894_s26, 2  ;;  %s256_s10 = scalar_lea.sflag (!%p1842_p3), [#allocation6], %s1894_s26 }
  0x25   : > { %s259_s24 = scalar_lea.vmem (!%p1842_p3), [#allocation5], %s1318_s27 }
  0x27   : > { %1709 = dma.done.wait (%p1870_p13), %s256_s10, 64  }
  0x28   : > { %1711 = vsyncadd (%p1870_p13), %s256_s10, 4294967232 }
  0x29   : > { %1713 = dma.done.wait (%p1834_p1), [#allocation9], 1536  }
  0x2a   : > { %1715 = vsyncadd (%p1834_p1), [#allocation9], 4294965760  ;;  %v1349_v0 = vld [vmem:[#allocation8 + $0x30] sm:$0xf]  ;;  %v1395_v1 = vld [vmem:[#allocation8 + $0x34] sm:$0xf0] }
  0x2b   : > { %v1341_v2 = vld [vmem:[#allocation8 + $0x20] sm:$0xf]  ;;  %v1350_v3 = vor.u32 %v1395_v1, %v1349_v0  ;;  %v1393_v4 = vld [vmem:[#allocation8 + $0x24] sm:$0xf0]  ;;  %v1333_v6 = vld [vmem:[#allocation8 + $0x10] sm:$0xf] }
  0x2c   : > { %v1342_v5 = vor.u32 %v1393_v4, %v1341_v2  ;;  %v1391_v7 = vld [vmem:[#allocation8 + $0x14] sm:$0xf0]  ;;  %v1325_v9 = vld [vmem:[#allocation8] sm:$0xf]  ;;  %v1389_v10 = vld [vmem:[#allocation8 + $0x4] sm:$0xf0] }
  0x2d   : > { %364 = vmatpush.bf16.msra.mxu0 %v1350_v3  ;;  %v1334_v8 = vor.u32 %v1391_v7, %v1333_v6  ;;  %v1326_v11 = vor.u32 %v1389_v10, %v1325_v9  ;;  %v307_v12 = vld [vmem:[%s259_s24] sm:$0xf]  ;;  %vm356_vm0 = vcmask 523264   ;;  %vm388_vm1 = vcmask 60416   ;;  %s1754_s25 = smov 40   ;;  %s1755_s29 = smov 64  }
  0x2e   : > { %s1756_s28 = smov 120   ;;  %s1757_s8 = smov 56   ;;  %v1394_v18 = vld [vmem:[#allocation8 + $0x34] sm:$0xf]  ;;  %v1351_v19 = vld [vmem:[#allocation8 + $0x38] sm:$0xf0] }
  0x2f   : > { %s1758_s9 = smov 112   ;;  %s1759_s11 = smov 48   ;;  %v1354_v20 = vor.u32 %v1394_v18, %v1351_v19  ;;  %v1392_v21 = vld [vmem:[#allocation8 + $0x24] sm:$0xf]  ;;  %v1343_v22 = vld [vmem:[#allocation8 + $0x28] sm:$0xf0] }
  0x30   : > { %s1760_s12 = smov 104   ;;  %s2146_s13 = smov 8   ;;  %v1346_v23 = vor.u32 %v1392_v21, %v1343_v22  ;;  %v1390_v24 = vld [vmem:[#allocation8 + $0x14] sm:$0xf]  ;;  %v1335_v25 = vld [vmem:[#allocation8 + $0x18] sm:$0xf0] }
  0x31   : > { %365 = vmatpush.bf16.msra.mxu0 %v1342_v5  ;;  %s1762_s14 = smov 16   ;;  %s1763_s15 = smov 80   ;;  %377 = vmatpush.bf16.msra.mxu1 %v1354_v20  ;;  %v1338_v26 = vor.u32 %v1390_v24, %v1335_v25  ;;  %v1388_v27 = vld [vmem:[#allocation8 + $0x4] sm:$0xf]  ;;  %v1327_v28 = vld [vmem:[#allocation8 + $0x8] sm:$0xf0] }
  0x32   : > { %s1764_s17 = smov 32   ;;  %s1765_s27 = smov 72   ;;  %v1330_v29 = vor.u32 %v1388_v27, %v1327_v28  ;;  %vm526_vm2 = vcmask 64512   ;;  %vm794_vm3 = vcmask 1043456  }
  0x33   : > { %s1766_s10 = smov 24   ;;  %s1767_s24 = smov 88  }
  0x35   : > { %366 = vmatpush.bf16.msra.mxu0 %v1334_v8  ;;  %378 = vmatpush.bf16.msra.mxu1 %v1346_v23 }
  0x39   : > { %367 = vmatpush.bf16.msra.mxu0 %v1326_v11  ;;  %379 = vmatpush.bf16.msra.mxu1 %v1338_v26 }
  0x3c   : > { %1355 = vmatmul.msk.bf16.vlgmr.msra.gmra.mxu0 %vm356_vm0, %v307_v12 }
  0x3d   : > { %380 = vmatpush.bf16.msra.mxu1 %v1330_v29 }
  0x40   : > { %1356 = vmatmul.msk.bf16.vlgmr.msra.gmra.mxu1 %vm356_vm0, %v307_v12 }
  0xb9   : > { %v369_v13 = vpop.f32.mrf.mxu0 }
  0xba   : > { %v386_v14 = vmul.f32 0.35355338, %v369_v13  ;;  %v390_v15 = vpack.c.bf16 %v369_v13, %v369_v13 }
  0xbc   : > { %v387_v16 = vpack.c.bf16 %v386_v14, %v386_v14  ;;  %435 = vrot.lane.b32.xlu2 %v390_v15, %s1754_s25  ;;  %392 = vrot.lane.b32.xlu0 %v390_v15, %s1755_s29  ;;  %s1768_s25 = smov 96   ;;  %s1322_s29 = sshll.u32 %s1894_s26, 6 }
  0xbd   : > { %v382_v5 = vpop.f32.mrf.mxu1 }
  0xbe   : > { %399 = vrot.lane.b32.xlu1 %v387_v16, %s1756_s28  ;;  %389 = vst.msk [vmem:[#allocation2] sm:$0xf] %vm388_vm1, %v387_v16  ;;  %v1948_v6 = vpack.c.bf16 %v382_v5, %v382_v5 }
  0xc0   : > { %397 = vst.msk [vmem:[#allocation4] sm:$0xf] %vm388_vm1, %v1948_v6 }
  0xc1   : > { %v371_v17 = vpop.f32.mrf.mxu0 }
  0xc4   : > { %404 = vrot.lane.b32.xlu0 %v390_v15, %s1757_s8  ;;  %415 = vrot.lane.b32.xlu2 %v387_v16, %s1758_s9  ;;  %s1396_s8 = sshll.u32 %s1738_s21, 6 }
  0xc5   : > { %v510_v45 = vld [vmem:[#allocation2] sm:$0xf]  ;;  %v384_v7 = vpop.f32.mrf.mxu1 }
  0xc6   : > { %420 = vrot.lane.b32.xlu1 %v390_v15, %s1759_s11 }
  0xc7   : > { %v783_v8 = vld [vmem:[#allocation4] sm:$0xf] }
  0xc8   : > { %v796_v9 = vsel %vm794_vm3, %v783_v8, 0 }
  0xcc   : > { %430 = vrot.lane.b32.xlu0 %v387_v16, %s1760_s12  ;;  %495 = vrot.lane.b32.xlu2 %v390_v15, %s2146_s13 }
  0xce   : > { %480 = vrot.lane.b32.xlu1 %v390_v15, %s1762_s14  ;;  %s1167_s14 = scalar_lea.hbm %s2145_s5, %s1396_s8 }
  0xd4   : > { %475 = vrot.lane.b32.xlu0 %v387_v16, %s1763_s15  ;;  %450 = vrot.lane.b32.xlu2 %v390_v15, %s1764_s17  ;;  %s1140_s17 = scalar_lea.sflag [#allocation13], %s1894_s26 }
  0xd6   : > { %490 = vrot.lane.b32.xlu1 %v387_v16, %s1765_s27 }
  0xdc   : > { %465 = vrot.lane.b32.xlu0 %v390_v15, %s1766_s10  ;;  %460 = vrot.lane.b32.xlu2 %v387_v16, %s1767_s24 }
  0xde   : > { %445 = vrot.lane.b32.xlu1 %v387_v16, %s1768_s25 }
  0xe4   : > { %440 = vrot.lane.b32.xlu0 %v1948_v6, %s1760_s12 }
  0xe6   : > { %425 = vrot.lane.b32.xlu1 %v1948_v6, %s1758_s9 }
 0x116   : > { %v436_v30 = vpop.permute.xlu2 %435 }
 0x117   : > { %439 = vst.msk [vmem:[#allocation3 + $0xc] sm:$0xf] %vm388_vm1, %v436_v30 }
 0x11e   : > { %v416_v31 = vpop.permute.xlu2 %415  ;;  %v521_v43 = vld [vmem:[#allocation3 + $0xc] sm:$0xf] }
 0x11f   : > { %419 = vst.msk [vmem:[#allocation2 + $0x8] sm:$0xf] %vm388_vm1, %v416_v31  ;;  %v588_v49 = vsel %vm526_vm2, %v521_v43, 0 }
 0x126   : > { %v496_v32 = vpop.permute.xlu2 %495  ;;  %v512_v60 = vld [vmem:[#allocation2 + $0x8] sm:$0xf] }
 0x127   : > { %499 = vst.msk [vmem:[#allocation3 + $0x1c] sm:$0xf] %vm388_vm1, %v496_v32 }
 0x12e   : > { %v393_v33 = vpop.permute.xlu0 %392  ;;  %v451_v34 = vpop.permute.xlu2 %450  ;;  %v525_v52 = vld [vmem:[#allocation3 + $0x1c] sm:$0xf] }
 0x12f   : > { %395 = vst.msk [vmem:[#allocation3] sm:$0xf] %vm388_vm1, %v393_v33  ;;  %v664_v55 = vsel %vm526_vm2, %v525_v52, 0 }
 0x130   : > { %454 = vst.msk [vmem:[#allocation3 + $0x10] sm:$0xf] %vm388_vm1, %v451_v34  ;;  %v400_v35 = vpop.permute.xlu1 %399 }
 0x131   : > { %403 = vst.msk [vmem:[#allocation2 + $0x4] sm:$0xf] %vm388_vm1, %v400_v35 }
 0x136   : > { %v405_v36 = vpop.permute.xlu0 %404  ;;  %v461_v37 = vpop.permute.xlu2 %460  ;;  %v518_v38 = vld [vmem:[#allocation3] sm:$0xf] }
 0x137   : > { %408 = vst.msk [vmem:[#allocation3 + $0x4] sm:$0xf] %vm388_vm1, %v405_v36  ;;  %v531_v39 = vsel %vm526_vm2, %v518_v38, 0  ;;  %v522_v40 = vld [vmem:[#allocation3 + $0x10] sm:$0xf] }
 0x138   : > { %464 = vst.msk [vmem:[#allocation2 + $0x14] sm:$0xf] %vm388_vm1, %v461_v37  ;;  %540 = vmatpush.bf16.xpose.msra.mxu2 %v531_v39  ;;  %v607_v41 = vsel %vm526_vm2, %v522_v40, 0  ;;  %v421_v42 = vpop.permute.xlu1 %420  ;;  %v511_v54 = vld [vmem:[#allocation2 + $0x4] sm:$0xf] }
 0x139   : > { %616 = vmatpush.bf16.xpose.msrb.mxu0 %v607_v41  ;;  %424 = vst.msk [vmem:[#allocation3 + $0x8] sm:$0xf] %vm388_vm1, %v421_v42 }
 0x13e   : > { %v431_v44 = vpop.permute.xlu0 %430  ;;  %v519_v46 = vld [vmem:[#allocation3 + $0x4] sm:$0xf] }
 0x13f   : > { %434 = vst.msk [vmem:[#allocation2 + $0xc] sm:$0xf] %vm388_vm1, %v431_v44  ;;  %1357 = vmatmul.msk.bf16.vlgmr.msra.gmra.mxu2 %vm526_vm2, %v510_v45  ;;  %v550_v47 = vsel %vm526_vm2, %v519_v46, 0  ;;  %v515_v2 = vld [vmem:[#allocation2 + $0x14] sm:$0xf] }
 0x140   : > { %559 = vmatpush.bf16.xpose.msra.mxu3 %v550_v47  ;;  %v481_v48 = vpop.permute.xlu1 %480  ;;  %v520_v50 = vld [vmem:[#allocation3 + $0x8] sm:$0xf] }
 0x141   : > { %484 = vst.msk [vmem:[#allocation3 + $0x18] sm:$0xf] %vm388_vm1, %v481_v48  ;;  %v569_v51 = vsel %vm526_vm2, %v520_v50, 0  ;;  %805 = vmatpush.bf16.msra.mxu0 %v796_v9 }
 0x142   : > { %578 = vmatpush.bf16.xpose.msrb.mxu2 %v569_v51 }
 0x146   : > { %v476_v53 = vpop.permute.xlu0 %475  ;;  %v513_v62 = vld [vmem:[#allocation2 + $0xc] sm:$0xf] }
 0x147   : > { %479 = vst.msk [vmem:[#allocation2 + $0x18] sm:$0xf] %vm388_vm1, %v476_v53  ;;  %1358 = vmatmul.msk.bf16.vlgmr.msra.gmra.mxu3 %vm526_vm2, %v511_v54 }
 0x148   : > { %597 = vmatpush.bf16.xpose.msrb.mxu3 %v588_v49  ;;  %v491_v56 = vpop.permute.xlu1 %490  ;;  %v524_v57 = vld [vmem:[#allocation3 + $0x18] sm:$0xf] }
 0x149   : > { %494 = vst.msk [vmem:[#allocation2 + $0x1c] sm:$0xf] %vm388_vm1, %v491_v56  ;;  %v645_v58 = vsel %vm526_vm2, %v524_v57, 0 }
 0x14a   : > { %654 = vmatpush.bf16.xpose.msra.mxu2 %v645_v58 }
 0x14e   : > { %v466_v59 = vpop.permute.xlu0 %465  ;;  %v516_v3 = vld [vmem:[#allocation2 + $0x18] sm:$0xf] }
 0x14f   : > { %469 = vst.msk [vmem:[#allocation3 + $0x14] sm:$0xf] %vm388_vm1, %v466_v59  ;;  %1359 = vmatmul.msk.bf16.vlgmr.msrb.gmra.mxu2 %vm526_vm2, %v512_v60 }
 0x150   : > { %673 = vmatpush.bf16.xpose.msra.mxu3 %v664_v55  ;;  %v446_v61 = vpop.permute.xlu1 %445  ;;  %v517_v4 = vld [vmem:[#allocation2 + $0x1c] sm:$0xf] }
 0x151   : > { %449 = vst.msk [vmem:[#allocation2 + $0x10] sm:$0xf] %vm388_vm1, %v446_v61 }
 0x156   : > { %v523_v63 = vld [vmem:[#allocation3 + $0x14] sm:$0xf]  ;;  %v441_v34 = vpop.permute.xlu0 %440 }
 0x157   : > { %1360 = vmatmul.msk.bf16.vlgmr.msrb.gmra.mxu3 %vm526_vm2, %v513_v62  ;;  %v626_v0 = vsel %vm526_vm2, %v523_v63, 0  ;;  %444 = vst.msk [vmem:[#allocation4 + $0xc] sm:$0xf] %vm388_vm1, %v441_v34 }
 0x158   : > { %635 = vmatpush.bf16.xpose.msrb.mxu1 %v626_v0  ;;  %v514_v1 = vld [vmem:[#allocation2 + $0x10] sm:$0xf]  ;;  %v426_v35 = vpop.permute.xlu1 %425 }
 0x159   : > { %1361 = vmatmul.msk.bf16.vlgmr.msrb.gmra.mxu0 %vm526_vm2, %v514_v1  ;;  %429 = vst.msk [vmem:[#allocation4 + $0x8] sm:$0xf] %vm388_vm1, %v426_v35 }
 0x15e   : > { %v786_v36 = vld [vmem:[#allocation4 + $0xc] sm:$0xf] }
 0x15f   : > { %1362 = vmatmul.msk.bf16.vlgmr.msrb.gmra.mxu1 %vm526_vm2, %v515_v2  ;;  %1363 = vmatmul.msk.bf16.vlgmr.msra.gmra.mxu2 %vm526_vm2, %v516_v3  ;;  %v853_v38 = vsel %vm794_vm3, %v786_v36, 0 }
 0x160   : > { %v785_v37 = vld [vmem:[#allocation4 + $0x8] sm:$0xf]  ;;  %862 = vmatpush.bf16.msrb.mxu3 %v853_v38 }
 0x161   : > { %v834_v39 = vsel %vm794_vm3, %v785_v37, 0 }
 0x162   : > { %843 = vmatpush.bf16.msrb.mxu2 %v834_v39 }
 0x167   : > { %1364 = vmatmul.msk.bf16.vlgmr.msra.gmra.mxu3 %vm526_vm2, %v517_v4 }
 0x1c2   : > { %v542_v10 = vpop.f32.mrf.mxu2 }
 0x1c3   : > { %v679_v23 = vsel %vm526_vm2, %v542_v10, -inf }
 0x1ca   : > { %v544_v11 = vpop.f32.mrf.mxu2  ;;  %v561_v12 = vpop.f32.mrf.mxu3 }
 0x1cb   : > { %v682_v28 = vsel %vm526_vm2, %v561_v12, -inf }
 0x1d2   : > { %v563_v13 = vpop.f32.mrf.mxu3  ;;  %v580_v14 = vpop.f32.mrf.mxu2 }
 0x1d3   : > { %v685_v27 = vsel %vm526_vm2, %v580_v14, -inf }
 0x1d6   : > { %v1957_v15 = vpop.f32.mrf.mxu0 }
 0x1d7   : > { %v691_v16 = vsel %vm526_vm2, %v1957_v15, -inf }
 0x1d8   : > { %692 = vmax.xlane.f32.xlu2 %v691_v16 }
 0x1da   : > { %v582_v17 = vpop.f32.mrf.mxu2  ;;  %v599_v18 = vpop.f32.mrf.mxu3 }
 0x1db   : > { %v688_v19 = vsel %vm526_vm2, %v599_v18, -inf }
 0x1dc   : > { %v1962_v20 = vpop.f32.mrf.mxu1  ;;  %689 = vmax.xlane.f32.xlu1 %v688_v19 }
 0x1dd   : > { %v694_v21 = vsel %vm526_vm2, %v1962_v20, -inf }
 0x1de   : > { %695 = vmax.xlane.f32.xlu0 %v694_v21  ;;  %v620_v22 = vpop.f32.mrf.mxu0 }
 0x1e0   : > { %680 = vmax.xlane.f32.xlu2 %v679_v23 }
 0x1e2   : > { %v601_v24 = vpop.f32.mrf.mxu3  ;;  %v656_v25 = vpop.f32.mrf.mxu2 }
 0x1e3   : > { %v697_v32 = vsel %vm526_vm2, %v656_v25, -inf }
 0x1e4   : > { %v639_v26 = vpop.f32.mrf.mxu1 }
 0x1e6   : > { %686 = vmax.xlane.f32.xlu0 %v685_v27 }
 0x1e8   : > { %683 = vmax.xlane.f32.xlu2 %v682_v28 }
 0x1ea   : > { %v658_v29 = vpop.f32.mrf.mxu2  ;;  %v1969_v30 = vpop.f32.mrf.mxu3 }
 0x1eb   : > { %v700_v31 = vsel %vm526_vm2, %v1969_v30, -inf }
 0x1ec   : > { %701 = vmax.xlane.f32.xlu1 %v700_v31 }
 0x1ee   : > { %698 = vmax.xlane.f32.xlu0 %v697_v32 }
 0x1f2   : > { %v677_v33 = vpop.f32.mrf.mxu3 }
 0x200   : > { %485 = vrot.lane.b32.xlu2 %v1948_v6, %s1763_s15  ;;  %s1170_s15 = sshll.u32 %s1167_s14, 4  ;;  %s1171_s15 = int_to_ptr.hbm [resolvable:$true] %s1170_s15 }
 0x205   : > { %410 = vrot.lane.b32.xlu1 %v1948_v6, %s1756_s28  ;;  %s2019_s28 = scalar_lea.vmem [#allocation12], %s1322_s29  ;;  %s1648_s29 = scalar_lea.hbm %s2145_s5, 128 }
 0x206   : > { %s1168_s9 = sshll.u32 %s2019_s28, 4  ;;  %s1169_s9 = int_to_ptr.vmem [resolvable:$true] %s1168_s9 }
 0x24b   : > { %v693_v40 = vpop.xlane.xlu2 %692 }
 0x24c   : > { %v707_v60 = vsub.f32 %v1957_v15, %v693_v40 }
 0x24e   : > { %v719_v1 = vmul.f32 1.442695, %v707_v60 }
 0x24f   : > { %v690_v46 = vpop.xlane.xlu1 %689 }
 0x250   : > { %v706_v51 = vsub.f32 %v599_v18, %v690_v46 }
 0x251   : > { %v696_v41 = vpop.xlane.xlu0 %695 }
 0x252   : > { %v717_v55 = vmul.f32 1.442695, %v706_v51  ;;  %v708_v15 = vsub.f32 %v1962_v20, %v696_v41 }
 0x253   : > { %v681_v42 = vpop.xlane.xlu2 %680 }
 0x254   : > { %v703_v43 = vsub.f32 %v542_v10, %v681_v42  ;;  %v721_v16 = vmul.f32 1.442695, %v708_v15 }
 0x256   : > { %v711_v44 = vmul.f32 1.442695, %v703_v43 }
 0x258   : > { %1506 = vpow2.f32 %v711_v44 }
 0x259   : > { %v687_v45 = vpop.xlane.xlu0 %686 }
 0x25a   : > { %v705_v47 = vsub.f32 %v580_v14, %v687_v45 }
 0x25b   : > { %v684_v48 = vpop.xlane.xlu2 %683 }
 0x25c   : > { %v715_v49 = vmul.f32 1.442695, %v705_v47  ;;  %v704_v50 = vsub.f32 %v561_v12, %v684_v48 }
 0x25e   : > { %v1507_v52 = vpop.eup %1506  ;;  %1508 = vpow2.f32 %v715_v49  ;;  %v713_v53 = vmul.f32 1.442695, %v704_v50 }
 0x25f   : > { %v727_v54 = vsel %vm526_vm2, %v1507_v52, 0.0  ;;  %v702_v8 = vpop.xlane.xlu1 %701 }
 0x260   : > { %1510 = vpow2.f32 %v713_v53  ;;  %728 = vadd.xlane.f32.xlu2 %v727_v54  ;;  %v710_v17 = vsub.f32 %v1969_v30, %v702_v8  ;;  %v956_v8 = vld [vmem:[#allocation10 + $0x10] sm:$0xf] }
 0x261   : > { %v699_v56 = vpop.xlane.xlu0 %698  ;;  %1512 = vpow2.f32 %v717_v55 }
 0x262   : > { %v709_v57 = vsub.f32 %v656_v25, %v699_v56  ;;  %v725_v19 = vmul.f32 1.442695, %v710_v17 }
 0x263   : > { %v486_v58 = vpop.permute.xlu2 %485 }
 0x264   : > { %v1983_v59 = vpop.eup %1508  ;;  %v723_v61 = vmul.f32 1.442695, %v709_v57  ;;  %489 = vst.msk [vmem:[#allocation4 + $0x18] sm:$0xf] %vm388_vm1, %v486_v58 }
 0x265   : > { %v733_v63 = vsel %vm526_vm2, %v1983_v59, 0.0 }
 0x266   : > { %v1511_v62 = vpop.eup %1510  ;;  %1514 = vpow2.f32 %v723_v61 }
 0x267   : > { %v730_v0 = vsel %vm526_vm2, %v1511_v62, 0.0  ;;  %v1990_v2 = vpop.eup %1512  ;;  %1516 = vpow2.f32 %v719_v1  ;;  %v953_v1 = vld [vmem:[#allocation10 + $0x4] sm:$0xf] }
 0x268   : > { %734 = vadd.xlane.f32.xlu2 %v733_v63  ;;  %731 = vadd.xlane.f32.xlu0 %v730_v0  ;;  %v736_v9 = vsel %vm526_vm2, %v1990_v2, 0.0  ;;  %1518 = vpow2.f32 %v721_v16  ;;  %v952_v63 = vld [vmem:[#allocation10] sm:$0xf] }
 0x269   : > { %1520 = vpow2.f32 %v725_v19  ;;  %v964_v0 = vsel %vm794_vm3, %v952_v63, 0 }
 0x26b   : > { %v789_v3 = vld [vmem:[#allocation4 + $0x18] sm:$0xf] }
 0x26c   : > { %v1515_v4 = vpop.eup %1514  ;;  %v910_v5 = vsel %vm794_vm3, %v789_v3, 0  ;;  %v954_v3 = vld [vmem:[#allocation10 + $0x8] sm:$0xf] }
 0x26d   : > { %919 = vmatpush.bf16.msra.mxu2 %v910_v5  ;;  %v745_v7 = vsel %vm526_vm2, %v1515_v4, 0.0  ;;  %v1996_v10 = vpop.eup %1516  ;;  %v955_v5 = vld [vmem:[#allocation10 + $0xc] sm:$0xf] }
 0x26e   : > { %746 = vadd.xlane.f32.xlu1 %v745_v7  ;;  %v739_v11 = vsel %vm526_vm2, %v1996_v10, 0.0  ;;  %v2010_v18 = vpop.eup %1518  ;;  %v1021_v7 = vsel %vm794_vm3, %v955_v5, 0 }
 0x26f   : > { %v742_v21 = vsel %vm526_vm2, %v2010_v18, 0.0  ;;  %v2014_v22 = vpop.eup %1520 }
 0x270   : > { %737 = vadd.xlane.f32.xlu2 %v736_v9  ;;  %v748_v23 = vsel %vm526_vm2, %v2014_v22, 0.0  ;;  %v1040_v9 = vsel %vm794_vm3, %v956_v8, 0 }
 0x276   : > { %740 = vadd.xlane.f32.xlu1 %v739_v11 }
 0x277   : > { %v411_v12 = vpop.permute.xlu1 %410 }
 0x278   : > { %414 = vst.msk [vmem:[#allocation4 + $0x4] sm:$0xf] %vm388_vm1, %v411_v12 }
 0x27c   : > { %455 = vrot.lane.b32.xlu0 %v1948_v6, %s1768_s25 }
 0x27f   : > { %v784_v13 = vld [vmem:[#allocation4 + $0x4] sm:$0xf] }
 0x280   : > { %v815_v14 = vsel %vm794_vm3, %v784_v13, 0 }
 0x281   : > { %824 = vmatpush.bf16.msra.mxu1 %v815_v14 }
 0x288   : > { %500 = vrot.lane.b32.xlu2 %v1948_v6, %s1765_s27  ;;  %s1642_s27 = sshra.s32 %s1171_s15, 4  ;;  %s1643_s27 = int_to_ptr.hbm [resolvable:$true] %s1642_s27 }
 0x289   : > { %s1644_s10 = scalar_lea.hbm %s1643_s27, 64  ;;  %p1649_p9 = scmp.lt.s32.totalorder %s1643_s27, %s2145_s5 }
 0x28a   : > { %p1645_p1 = scmp.ne.s32.totalorder %s1643_s27, %s1644_s10  ;;  %p1650_p10 = scmp.lt.s32.totalorder %s1648_s29, %s1644_s10 }
 0x28c   : > { %p1646_p3 = pnand %p1645_p1, %p1874_p0  ;;  %p1651_p12 = por %p1650_p10, %p1649_p9 }
 0x28e   : > { %p1647_p8 = pneg %p1646_p3 }
 0x28f   : > { %470 = vrot.lane.b32.xlu1 %v1948_v6, %s1767_s24 }
 0x290   : > { %p1652_p13 = pnand %p1651_p12, %p1647_p8 }
 0x2a6   : > { %743 = vadd.xlane.f32.xlu0 %v742_v21 }
 0x2b1   : > { %749 = vadd.xlane.f32.xlu2 %v748_v23 }
 0x2d3   : > { %v729_v6 = vpop.xlane.xlu2 %728 }
 0x2d4   : > { %1522 = vrcp.f32 %v729_v6 }
 0x2da   : > { %v1523_v20 = vpop.eup %1522 }
 0x2db   : > { %v759_v24 = vmul.f32 %v1523_v20, %v1507_v52  ;;  %v732_v25 = vpop.xlane.xlu0 %731  ;;  %v735_v26 = vpop.xlane.xlu2 %734 }
 0x2dc   : > { %1524 = vrcp.f32 %v732_v25 }
 0x2dd   : > { %767 = vst.msk [vmem:[%s2019_s28] sm:$0xff] %vm526_vm2, %v759_v24  ;;  %v775_v27 = vpack.c.bf16 %v759_v24, %v759_v24  ;;  %1526 = vrcp.f32 %v735_v26 }
 0x2df   : > { %1365 = vmatmul.msk.bf16.vlgmr.msra.gmra.mxu0 %vm526_vm2, %v775_v27 }
 0x2e1   : > { %v747_v28 = vpop.xlane.xlu1 %746 }
 0x2e2   : > { %v1525_v29 = vpop.eup %1524  ;;  %1528 = vrcp.f32 %v747_v28  ;;  %v957_v28 = vld [vmem:[#allocation10 + $0x14] sm:$0xf] }
 0x2e3   : > { %v1527_v30 = vpop.eup %1526  ;;  %v760_v31 = vmul.f32 %v1525_v29, %v1511_v62  ;;  %v738_v32 = vpop.xlane.xlu2 %737  ;;  %v1059_v29 = vsel %vm794_vm3, %v957_v28, 0 }
 0x2e4   : > { %v761_v33 = vmul.f32 %v1527_v30, %v1983_v59  ;;  %1530 = vrcp.f32 %v738_v32 }
 0x2e5   : > { %768 = vst.msk [vmem:[%s2019_s28 + $0x8] sm:$0xff] %vm526_vm2, %v760_v31  ;;  %v776_v34 = vpack.c.bf16 %v760_v31, %v760_v31  ;;  %v959_v31 = vld [vmem:[#allocation10 + $0x1c] sm:$0xf] }
 0x2e6   : > { %769 = vst.msk [vmem:[%s2019_s28 + $0x10] sm:$0xff] %vm526_vm2, %v761_v33  ;;  %v777_v35 = vpack.c.bf16 %v761_v33, %v761_v33  ;;  %v1097_v32 = vsel %vm794_vm3, %v959_v31, 0 }
 0x2e7   : > { %1366 = vmatmul.msk.bf16.vlgmr.msra.gmra.mxu1 %vm526_vm2, %v776_v34 }
 0x2e8   : > { %v1529_v36 = vpop.eup %1528  ;;  %1367 = vmatmul.msk.bf16.vlgmr.msrb.gmra.mxu2 %vm526_vm2, %v777_v35 }
 0x2e9   : > { %v765_v37 = vmul.f32 %v1529_v36, %v1515_v4  ;;  %v741_v38 = vpop.xlane.xlu1 %740  ;;  %v1002_v4 = vsel %vm794_vm3, %v954_v3, 0 }
 0x2ea   : > { %v1531_v39 = vpop.eup %1530  ;;  %1532 = vrcp.f32 %v741_v38  ;;  %1011 = vmatpush.bf16.msrb.mxu2 %v1002_v4 }
 0x2eb   : > { %773 = vst.msk [vmem:[%s2019_s28 + $0x30] sm:$0xff] %vm526_vm2, %v765_v37  ;;  %v762_v40 = vmul.f32 %v1531_v39, %v1990_v2  ;;  %v501_v41 = vpop.permute.xlu2 %500  ;;  %v781_v48 = vpack.c.bf16 %v765_v37, %v765_v37  ;;  %v983_v2 = vsel %vm794_vm3, %v953_v1, 0 }
 0x2ec   : > { %504 = vst.msk [vmem:[#allocation4 + $0x1c] sm:$0xf] %vm388_vm1, %v501_v41 }
 0x2ed   : > { %770 = vst.msk [vmem:[%s2019_s28 + $0x18] sm:$0xff] %vm526_vm2, %v762_v40  ;;  %v778_v42 = vpack.c.bf16 %v762_v40, %v762_v40 }
 0x2ee   : > { %v456_v43 = vpop.permute.xlu0 %455 }
 0x2ef   : > { %459 = vst.msk [vmem:[#allocation4 + $0x10] sm:$0xf] %vm388_vm1, %v456_v43  ;;  %1368 = vmatmul.msk.bf16.vlgmr.msrb.gmra.mxu3 %vm526_vm2, %v778_v42 }
 0x2f0   : > { %v1533_v44 = vpop.eup %1532 }
 0x2f1   : > { %v763_v45 = vmul.f32 %v1533_v44, %v1996_v10  ;;  %v958_v10 = vld [vmem:[#allocation10 + $0x18] sm:$0xf] }
 0x2f2   : > { %v1078_v11 = vsel %vm794_vm3, %v958_v10, 0 }
 0x2f3   : > { %771 = vst.msk [vmem:[%s2019_s28 + $0x20] sm:$0xff] %vm526_vm2, %v763_v45  ;;  %v790_v46 = vld [vmem:[#allocation4 + $0x1c] sm:$0xf]  ;;  %v779_v51 = vpack.c.bf16 %v763_v45, %v763_v45 }
 0x2f4   : > { %v929_v47 = vsel %vm794_vm3, %v790_v46, 0 }
 0x2f5   : > { %938 = vmatpush.bf16.msra.mxu3 %v929_v47 }
 0x2f6   : > { %v787_v49 = vld [vmem:[#allocation4 + $0x10] sm:$0xf] }
 0x2f7   : > { %v872_v50 = vsel %vm794_vm3, %v787_v49, 0 }
 0x2f8   : > { %1371 = vmatmul.msk.bf16.vlgmr.msra.gmra.mxu2 %vm526_vm2, %v781_v48  ;;  %881 = vmatpush.bf16.msrb.mxu0 %v872_v50 }
 0x2f9   : > { %1030 = vmatpush.bf16.msrb.mxu3 %v1021_v7  ;;  %1087 = vmatpush.bf16.msra.mxu2 %v1078_v11 }
 0x2fb   : > { %1369 = vmatmul.msk.bf16.vlgmr.msrb.gmra.mxu0 %vm526_vm2, %v779_v51 }
 0x2fc   : > { %973 = vmatpush.bf16.msra.mxu0 %v964_v0 }
 0x300   : > { %1049 = vmatpush.bf16.msrb.mxu0 %v1040_v9 }
 0x301   : > { %v471_v52 = vpop.permute.xlu1 %470 }
 0x302   : > { %474 = vst.msk [vmem:[#allocation4 + $0x14] sm:$0xf] %vm388_vm1, %v471_v52 }
 0x309   : > { %v788_v53 = vld [vmem:[#allocation4 + $0x14] sm:$0xf] }
 0x30a   : > { %v891_v54 = vsel %vm794_vm3, %v788_v53, 0 }
 0x30b   : > { %900 = vmatpush.bf16.msrb.mxu1 %v891_v54 }
 0x30f   : > { %992 = vmatpush.bf16.msra.mxu1 %v983_v2 }
 0x319   : > { %v744_v55 = vpop.xlane.xlu0 %743 }
 0x31a   : > { %1534 = vrcp.f32 %v744_v55 }
 0x320   : > { %v1535_v56 = vpop.eup %1534 }
 0x321   : > { %v764_v57 = vmul.f32 %v1535_v56, %v2010_v18 }
 0x323   : > { %772 = vst.msk [vmem:[%s2019_s28 + $0x28] sm:$0xff] %vm526_vm2, %v764_v57  ;;  %v780_v58 = vpack.c.bf16 %v764_v57, %v764_v57 }
 0x324   : > { %v750_v59 = vpop.xlane.xlu2 %749 }
 0x325   : > { %1536 = vrcp.f32 %v750_v59  ;;  %1370 = vmatmul.msk.bf16.vlgmr.msrb.gmra.mxu1 %vm526_vm2, %v780_v58 }
 0x326   : > { %1068 = vmatpush.bf16.msrb.mxu1 %v1059_v29 }
 0x32b   : > { %v1537_v60 = vpop.eup %1536 }
 0x32c   : > { %v766_v61 = vmul.f32 %v1537_v60, %v2014_v22 }
 0x32e   : > { %774 = vst.msk [vmem:[%s2019_s28 + $0x38] sm:$0xff] %vm526_vm2, %v766_v61  ;;  %v782_v62 = vpack.c.bf16 %v766_v61, %v766_v61 }
 0x330   : > { %1372 = vmatmul.msk.bf16.vlgmr.msra.gmra.mxu3 %vm526_vm2, %v782_v62 }
 0x331   : > { %1106 = vmatpush.bf16.msra.mxu3 %v1097_v32 }
 0x35c   : > { %v807_v12 = vpop.f32.mrf.mxu0 }
 0x35d   : > { %v944_v13 = vpack.c.bf16 %v807_v12, %v807_v12 }
 0x35f   : > { %1373 = vmatmul.msk.bf16.vlgmr.msra.gmra.mxu0 %vm526_vm2, %v944_v13 }
 0x364   : > { %v809_v14 = vpop.f32.mrf.mxu0  ;;  %v826_v15 = vpop.f32.mrf.mxu1 }
 0x365   : > { %v945_v16 = vpack.c.bf16 %v826_v15, %v826_v15 }
 0x367   : > { %1374 = vmatmul.msk.bf16.vlgmr.msra.gmra.mxu1 %vm526_vm2, %v945_v16 }
 0x36b   : > { %v845_v17 = vpop.f32.mrf.mxu2 }
 0x36c   : > { %v946_v18 = vpack.c.bf16 %v845_v17, %v845_v17  ;;  %v828_v19 = vpop.f32.mrf.mxu1 }
 0x36e   : > { %1375 = vmatmul.msk.bf16.vlgmr.msrb.gmra.mxu2 %vm526_vm2, %v946_v18 }
 0x372   : > { %v864_v21 = vpop.f32.mrf.mxu3 }
 0x373   : > { %v847_v22 = vpop.f32.mrf.mxu2  ;;  %v947_v23 = vpack.c.bf16 %v864_v21, %v864_v21 }
 0x375   : > { %1376 = vmatmul.msk.bf16.vlgmr.msrb.gmra.mxu3 %vm526_vm2, %v947_v23 }
 0x378   : > { %v883_v6 = vpop.f32.mrf.mxu0 }
 0x379   : > { %v948_v20 = vpack.c.bf16 %v883_v6, %v883_v6 }
 0x37a   : > { %v866_v24 = vpop.f32.mrf.mxu3 }
 0x37b   : > { %v921_v25 = vpop.f32.mrf.mxu2  ;;  %1377 = vmatmul.msk.bf16.vlgmr.msrb.gmra.mxu0 %vm526_vm2, %v948_v20 }
 0x37c   : > { %v950_v26 = vpack.c.bf16 %v921_v25, %v921_v25 }
 0x37e   : > { %1379 = vmatmul.msk.bf16.vlgmr.msra.gmra.mxu2 %vm526_vm2, %v950_v26 }
 0x380   : > { %v885_v27 = vpop.f32.mrf.mxu0 }
 0x383   : > { %v923_v30 = vpop.f32.mrf.mxu2 }
 0x3a2   : > { %v902_v33 = vpop.f32.mrf.mxu1 }
 0x3a3   : > { %v949_v34 = vpack.c.bf16 %v902_v33, %v902_v33 }
 0x3a5   : > { %1378 = vmatmul.msk.bf16.vlgmr.msrb.gmra.mxu1 %vm526_vm2, %v949_v34 }
 0x3aa   : > { %v904_v35 = vpop.f32.mrf.mxu1 }
 0x3b3   : > { %v940_v36 = vpop.f32.mrf.mxu3 }
 0x3b4   : > { %v951_v37 = vpack.c.bf16 %v940_v36, %v940_v36 }
 0x3b6   : > { %1380 = vmatmul.msk.bf16.vlgmr.msra.gmra.mxu3 %vm526_vm2, %v951_v37 }
 0x3bb   : > { %v942_v38 = vpop.f32.mrf.mxu3 }
 0x3bc   : > { %1655 = shalt.err (!%p1652_p13)
}
 0x3bd   : > { %s1769_s8 = smov 128   ;;  %s2152_s11 = smov 8   ;;  %v1505_v3 = vld [vmem:[%s2143_s3] ss:$0 sm:$0xff] }
 0x3be   : > { %1408 = dma.vmem_to_hbm [thread:$0]  (%p1874_p0), %s1169_s9, 1024, %s1171_s15, %s1140_s17, %s1769_s8, %s1769_s8, %s2152_s11  }
 0x3bf   : > { %s1321_s13 = sshll.u32 %s1894_s26, 3  ;;  %s1383_s9 = sshll.u32 %s1738_s21, 3 }
 0x3c0   : > { %s1151_s15 = scalar_lea.hbm %s2144_s4, %s1383_s9  ;;  %s294_s10 = scalar_lea.vmem [#allocation11], %s1321_s13 }
 0x3c1   : > { %s1153_s24 = sshll.u32 %s294_s10, 4  ;;  %s1155_s21 = sshll.u32 %s1151_s15, 4  ;;  %s1154_s24 = int_to_ptr.vmem [resolvable:$true] %s1153_s24  ;;  %s1156_s21 = int_to_ptr.hbm [resolvable:$true] %s1155_s21 }
 0x3c2   : > { %s1135_s25 = scalar_lea.sflag [#allocation7], %s1894_s26  ;;  %s1670_s29 = sshra.s32 %s1156_s21, 4  ;;  %s1671_s29 = int_to_ptr.hbm [resolvable:$true] %s1670_s29 }
 0x3c3   : > { %s1672_s28 = scalar_lea.hbm %s1671_s29, 8  ;;  %s1676_s13 = scalar_lea.hbm %s2144_s4, 16 }
 0x3c4   : > { %p1673_p2 = scmp.ne.s32.totalorder %s1671_s29, %s1672_s28  ;;  %p1677_p11 = scmp.lt.s32.totalorder %s1671_s29, %s2144_s4 }
 0x3c5   : > { %p1678_p1 = scmp.lt.s32.totalorder %s1676_s13, %s1672_s28 }
 0x3c6   : > { %p1674_p4 = pnand %p1673_p2, %p1874_p0 }
 0x3c7   : > { %p1679_p3 = por %p1678_p1, %p1677_p11 }
 0x3c8   : > { %p1675_p7 = pneg %p1674_p4 }
 0x3ca   : > { %p1680_p8 = pnand %p1679_p3, %p1675_p7 }
 0x3dc   : > { %v975_v39 = vpop.f32.mrf.mxu0 }
 0x3dd   : > { %v1113_v42 = vsel %vm356_vm0, %v975_v39, 0.0 }
 0x3e4   : > { %v977_v40 = vpop.f32.mrf.mxu0  ;;  %v994_v41 = vpop.f32.mrf.mxu1 }
 0x3e5   : > { %v1114_v43 = vsel %vm356_vm0, %v994_v41, 0.0 }
 0x3e6   : > { %v1115_v44 = vadd.f32 %v1114_v43, %v1113_v42 }
 0x3ec   : > { %v996_v45 = vpop.f32.mrf.mxu1 }
 0x3f1   : > { %v1013_v46 = vpop.f32.mrf.mxu2 }
 0x3f2   : > { %v1116_v55 = vsel %vm356_vm0, %v1013_v46, 0.0 }
 0x3f3   : > { %v1117_v58 = vadd.f32 %v1116_v55, %v1115_v44 }
 0x3f8   : > { %v1032_v47 = vpop.f32.mrf.mxu3  ;;  %v1051_v48 = vpop.f32.mrf.mxu0 }
 0x3f9   : > { %v1015_v49 = vpop.f32.mrf.mxu2  ;;  %v1118_v57 = vsel %vm356_vm0, %v1032_v47, 0.0  ;;  %v1120_v60 = vsel %vm356_vm0, %v1051_v48, 0.0 }
 0x3fa   : > { %v1119_v59 = vadd.f32 %v1118_v57, %v1117_v58 }
 0x3fc   : > { %v1121_v62 = vadd.f32 %v1120_v60, %v1119_v59 }
 0x400   : > { %v1034_v50 = vpop.f32.mrf.mxu3  ;;  %v1053_v51 = vpop.f32.mrf.mxu0 }
 0x401   : > { %v1089_v52 = vpop.f32.mrf.mxu2 }
 0x402   : > { %v1124_v0 = vsel %vm356_vm0, %v1089_v52, 0.0 }
 0x409   : > { %v1091_v53 = vpop.f32.mrf.mxu2 }
 0x422   : > { %v1070_v54 = vpop.f32.mrf.mxu1 }
 0x423   : > { %v1122_v61 = vsel %vm356_vm0, %v1070_v54, 0.0 }
 0x424   : > { %v1123_v63 = vadd.f32 %v1122_v61, %v1121_v62 }
 0x426   : > { %v1125_v2 = vadd.f32 %v1124_v0, %v1123_v63 }
 0x42a   : > { %v1072_v56 = vpop.f32.mrf.mxu1 }
 0x439   : > { %v1108_v1 = vpop.f32.mrf.mxu3 }
 0x43a   : > { %v1126_v4 = vsel %vm356_vm0, %v1108_v1, 0.0 }
 0x43b   : > { %v1127_v5 = vadd.f32 %v1126_v4, %v1125_v2 }
 0x43d   : > { %v1132_v7 = vadd.f32 %v1505_v3, %v1127_v5 }
 0x43f   : > { %1133 = vst.msk [vmem:[%s294_s10] sm:$0xff] %vm356_vm0, %v1132_v7 }
 0x440   : > { %1683 = shalt.err (!%p1680_p8)
}
 0x441   : > { %1407 = dma.vmem_to_hbm [thread:$0]  (%p1874_p0), %s1154_s24, 128, %s1156_s21, %s1135_s25   ;;  %v1110_v8 = vpop.f32.mrf.mxu3 }
 0x442 PF: > { %s1185_s26 = sand.u32 1, %s1726_s18   ;;  %p1423_p9 = pnand %p1314_p6, %p1881_p5 }
 0x443   : > { %s1186_s14 = scalar_lea.sflag [#allocation7], %s1185_s26 }
 0x444   : > { %p1424_p10 = pneg %p1423_p9 }
 0x446   : > { %1717 = dma.done.wait (%p1424_p10), %s1186_s14, 128  }
 0x447   : > { %1719 = vsyncadd (%p1424_p10), %s1186_s14, 4294967168  ;;  %s1196_s15 = scalar_lea.sflag [#allocation13], %s1185_s26 }
 0x448   : > { %1721 = dma.done.wait (%p1424_p10), %s1196_s15, 1024  }
 0x449   : > { %1723 = vsyncadd (%p1424_p10), %s1196_s15, 4294966272  ;;  %s26_s23 = sadd.s32 1, %s1746_s23   ;;  %s2153_s18 = smov %s1730_s19 }
 0x44a   : > { %p23_p12 = scmp.ge.s32.totalorder %s26_s23, 4   ;;  %s2154_s19 = smov %s1734_s20 }
 0x44b   : > { %s2155_s20 = smov %s1879_s6  ;;  %s2156_s21 = smov %s1742_s22 }
 0x44c   : > { %s2157_s22 = smov %s2159_s16  ;;  %25 = sbr.rel (!%p23_p12) target bundleno = 9 (0x9), region = 132 }
 0x451   :  { %1202 = vsyncpa [#allocation6], 1 }
 0x452   :  { %1204 = vsyncpa [#allocation6 + $0x1], 1 }
 0x453   :  { %1205 = vsyncpa [#allocation9], 1 }
 0x454   :  { %1206 = vsyncpa [#allocation7], 1 }
 0x455   :  { %1208 = vsyncpa [#allocation7 + $0x1], 1 }
 0x456   :  { %1209 = vsyncpa [#allocation13], 1 }
 0x457   :  { %1211 = vsyncpa [#allocation13 + $0x1], 1 }

</bundles_post_ra>
